<compile_context>
chip_gen: v6e
topology: v6e:2x2x1
jax: 0.10.0
libtpu: 0.0.40
codegen_flags: <defaults>
</compile_context>

<pallas_src>
import jax
import jax.numpy as jnp
from jax.experimental import pallas as pl
from jax.experimental.pallas import tpu as pltpu

KH = KW = 3          # kernel_size = 3
PAD = 1              # padding = 1
# stride = 1, dilation = 1, groups = 1 (module defaults)


def _conv_tanh_kernel(x_ref, w_ref, b_ref, o_ref, xpad_ref, patch_ref):
    """One batch element per grid step.

    x_ref    : (1, Cin, H, W)        bf16 unpadded input tile (NCHW slice)
    w_ref    : (Cout, KH*KW*Cin)     bf16 weights, rows ordered (kh, kw, cin)
    b_ref    : (Cout, 1)             f32 conv bias
    o_ref    : (1, Cout, H*W)        f32 lane-dense output tile
    xpad_ref : (Cin, H+2, W+2)       f32 VMEM scratch (zero-padded input)
    patch_ref: (KH*KW*Cin, H*W)      f32 VMEM scratch (im2col patch matrix)
    """
    _, Cin, H, W = x_ref.shape
    HW = H * W

    # In-kernel zero padding (replaces the wrapper-side jnp.pad HBM pass).
    xpad_ref[...] = jnp.zeros_like(xpad_ref)
    xpad_ref[:, PAD:PAD + H, PAD:PAD + W] = x_ref[0].astype(xpad_ref.dtype)

    # im2col: build the (KH*KW*Cin, H*W) patch matrix once per step.
    for kh in range(KH):
        for kw in range(KW):
            tap = kh * KW + kw
            win = xpad_ref[:, kh:kh + H, kw:kw + W]          # (Cin, H, W)
            patch_ref[tap * Cin:(tap + 1) * Cin, :] = win.reshape(Cin, HW)

    # Single MXU matmul: (Cout, 36) @ (36, H*W) -> (Cout, H*W), f32 accumulate.
    acc = jnp.dot(w_ref[...],
                  patch_ref[...].astype(jnp.bfloat16),
                  preferred_element_type=jnp.float32)        # (Cout, HW)

    acc = acc + b_ref[...]                                   # (Cout, 1) bcast over lanes
    out = jnp.tanh(acc) * 0.5 + 0.5                          # f32 epilogue
    o_ref[...] = out[None, :, :].astype(o_ref.dtype)


def conv_bn_tanh_2d(x_nchw, weight_oihw, bias):
    """x_nchw: (N, Cin, H, W) float32 -> (N, Cout, H, W) float32."""
    N, Cin, H, W = x_nchw.shape
    Cout = weight_oihw.shape[0]
    HW = H * W
    K = KH * KW * Cin
    Hp, Wp = H + 2 * PAD, W + 2 * PAD

    # bf16 MXU operands (accumulation stays f32 inside the kernel).
    x_bf16 = x_nchw.astype(jnp.bfloat16)
    # (Cout, Cin, KH, KW) -> (Cout, KH, KW, Cin) -> (Cout, KH*KW*Cin); the row
    # ordering (kh, kw, cin) matches the im2col patch rows built in-kernel.
    w_mat = jnp.transpose(weight_oihw, (0, 2, 3, 1)).reshape(Cout, K)
    w_mat = w_mat.astype(jnp.bfloat16)
    b_col = bias.reshape(Cout, 1).astype(jnp.float32)

    out_flat = pl.pallas_call(
        _conv_tanh_kernel,
        out_shape=jax.ShapeDtypeStruct((N, Cout, HW), x_nchw.dtype),
        grid_spec=pltpu.PrefetchScalarGridSpec(
            num_scalar_prefetch=0,
            grid=(N,),
            in_specs=[
                pl.BlockSpec((1, Cin, H, W), lambda n: (n, 0, 0, 0)),
                pl.BlockSpec((Cout, K), lambda n: (0, 0)),
                pl.BlockSpec((Cout, 1), lambda n: (0, 0)),
            ],
            out_specs=pl.BlockSpec((1, Cout, HW), lambda n: (n, 0, 0)),
            scratch_shapes=[
                pltpu.VMEM((Cin, Hp, Wp), jnp.float32),   # padded input
                pltpu.VMEM((K, HW), jnp.float32),         # im2col patches
            ],
        ),
        # "parallel" lets v7x shard the batch over its 2 TensorCores; measured
        # near-zero effect on single-TC v5e/v6e.
        compiler_params=pltpu.CompilerParams(
            dimension_semantics=("parallel",)),
    )(x_bf16, w_mat, b_col)

    # Contiguous (free) reshape back to NCHW — no transpose pass needed.
    return out_flat.reshape(N, Cout, H, W)


if __name__ == "__main__":
    # Small shapes consistent with the module: batch=2, Cin=4, Cout=8, 16x16.
    N, Cin, Cout, H, W = 2, 4, 8, 16, 16

    key = jax.random.PRNGKey(0)
    kx, kw_, kb = jax.random.split(key, 3)

    x = jax.random.normal(kx, (N, Cin, H, W), dtype=jnp.float32)
    # Deterministic parameter init (PyTorch-style uniform bound 1/sqrt(fan_in)).
    fan_in = Cin * KH * KW
    bound = 1.0 / (fan_in ** 0.5)
    weight = jax.random.uniform(kw_, (Cout, Cin, KH, KW), jnp.float32,
                                minval=-bound, maxval=bound)
    bias = jax.random.uniform(kb, (Cout,), jnp.float32,
                              minval=-bound, maxval=bound)

    y = conv_bn_tanh_2d(x, weight, bias)
    y = jax.block_until_ready(y)

    # Reference with the same bf16-rounded conv operands (f32 accumulation),
    # same semantics as the PyTorch forward.
    xr = x.astype(jnp.bfloat16).astype(jnp.float32)
    wr = weight.astype(jnp.bfloat16).astype(jnp.float32)
    ref = jax.lax.conv_general_dilated(
        xr, wr, window_strides=(1, 1), padding=((PAD, PAD), (PAD, PAD)),
        dimension_numbers=("NCHW", "OIHW", "NCHW"),
        precision=jax.lax.Precision.HIGHEST)
    ref = jnp.tanh(ref + bias.reshape(1, Cout, 1, 1)) / 2.0 + 0.5

    assert y.shape == (N, Cout, H, W)
    assert jnp.allclose(y, ref, atol=2e-3, rtol=1e-3), (
        float(jnp.max(jnp.abs(y - ref))))

    print("KERNEL_OK")
</pallas_src>

<mosaic_0001>
module attributes {stable_mosaic.version = 11 : i64} {
  func.func @_conv_tanh_kernel(%arg0: i32, %arg1: memref<1x4x16x16xbf16, #tpu.memory_space<vmem>>, %arg2: memref<8x36xbf16, #tpu.memory_space<vmem>>, %arg3: memref<8x1xf32, #tpu.memory_space<vmem>>, %arg4: memref<1x8x256xf32, #tpu.memory_space<vmem>>, %arg5: memref<4x18x18xf32, #tpu.memory_space<vmem>>, %arg6: memref<36x256xf32, #tpu.memory_space<vmem>>) attributes {dimension_semantics = [#tpu.dimension_semantics<parallel>], iteration_bounds = array<i64: 2>, scalar_prefetch = 0 : i64, scratch_operands = 2 : i64, tpu.core_type = #tpu.core_type<tc>, window_params = [{transform_indices = @transform_0, window_bounds = array<i64: 1, 4, 16, 16>}, {pipeline_mode = #tpu.pipeline_mode<synchronous>, transform_indices = @transform_1, window_bounds = array<i64: 8, 36>}, {pipeline_mode = #tpu.pipeline_mode<synchronous>, transform_indices = @transform_2, window_bounds = array<i64: 8, 1>}, {transform_indices = @transform_3, window_bounds = array<i64: 1, 8, 256>}]} {
    %cst = arith.constant 0.000000e+00 : f32
    %0 = vector.broadcast %cst : f32 to vector<4x18x18xf32>
    %c0 = arith.constant 0 : index
    %c0_0 = arith.constant 0 : index
    %c0_1 = arith.constant 0 : index
    %1 = vector.load %arg5[%c0, %c0_0, %c0_1] : memref<4x18x18xf32, #tpu.memory_space<vmem>>, vector<4x18x18xf32>
    tpu.vector_store %arg5[%c0, %c0_0, %c0_1], %0 {strides = array<i32>} : memref<4x18x18xf32, #tpu.memory_space<vmem>>, vector<4x18x18xf32>,
    %c0_2 = arith.constant 0 : index
    %c0_3 = arith.constant 0 : index
    %c0_4 = arith.constant 0 : index
    %c0_5 = arith.constant 0 : index
    %2 = vector.load %arg1[%c0_2, %c0_3, %c0_4, %c0_5] : memref<1x4x16x16xbf16, #tpu.memory_space<vmem>>, vector<1x4x16x16xbf16>
    %3 = vector.shape_cast %2 : vector<1x4x16x16xbf16> to vector<4x16x16xbf16>
    %4 = arith.extf %3 : vector<4x16x16xbf16> to vector<4x16x16xf32>
    %c0_6 = arith.constant 0 : index
    %c1 = arith.constant 1 : index
    %c1_7 = arith.constant 1 : index
    %5 = vector.load %arg5[%c0_6, %c1, %c1_7] : memref<4x18x18xf32, #tpu.memory_space<vmem>>, vector<4x16x16xf32>
    tpu.vector_store %arg5[%c0_6, %c1, %c1_7], %4 {strides = array<i32>} : memref<4x18x18xf32, #tpu.memory_space<vmem>>, vector<4x16x16xf32>,
    %c0_8 = arith.constant 0 : index
    %c0_9 = arith.constant 0 : index
    %c0_10 = arith.constant 0 : index
    %6 = vector.load %arg5[%c0_8, %c0_9, %c0_10] : memref<4x18x18xf32, #tpu.memory_space<vmem>>, vector<4x16x16xf32>
    %7 = vector.shape_cast %6 : vector<4x16x16xf32> to vector<4x256xf32>
    %c0_11 = arith.constant 0 : index
    %c0_12 = arith.constant 0 : index
    %8 = vector.load %arg6[%c0_11, %c0_12] : memref<36x256xf32, #tpu.memory_space<vmem>>, vector<4x256xf32>
    tpu.vector_store %arg6[%c0_11, %c0_12], %7 {strides = array<i32>} : memref<36x256xf32, #tpu.memory_space<vmem>>, vector<4x256xf32>,
    %c0_13 = arith.constant 0 : index
    %c0_14 = arith.constant 0 : index
    %c1_15 = arith.constant 1 : index
    %9 = vector.load %arg5[%c0_13, %c0_14, %c1_15] : memref<4x18x18xf32, #tpu.memory_space<vmem>>, vector<4x16x16xf32>
    %10 = vector.shape_cast %9 : vector<4x16x16xf32> to vector<4x256xf32>
    %c4 = arith.constant 4 : index
    %c0_16 = arith.constant 0 : index
    %11 = vector.load %arg6[%c4, %c0_16] : memref<36x256xf32, #tpu.memory_space<vmem>>, vector<4x256xf32>
    tpu.vector_store %arg6[%c4, %c0_16], %10 {strides = array<i32>} : memref<36x256xf32, #tpu.memory_space<vmem>>, vector<4x256xf32>,
    %c0_17 = arith.constant 0 : index
    %c0_18 = arith.constant 0 : index
    %c2 = arith.constant 2 : index
    %12 = vector.load %arg5[%c0_17, %c0_18, %c2] : memref<4x18x18xf32, #tpu.memory_space<vmem>>, vector<4x16x16xf32>
    %13 = vector.shape_cast %12 : vector<4x16x16xf32> to vector<4x256xf32>
    %c8 = arith.constant 8 : index
    %c0_19 = arith.constant 0 : index
    %14 = vector.load %arg6[%c8, %c0_19] : memref<36x256xf32, #tpu.memory_space<vmem>>, vector<4x256xf32>
    tpu.vector_store %arg6[%c8, %c0_19], %13 {strides = array<i32>} : memref<36x256xf32, #tpu.memory_space<vmem>>, vector<4x256xf32>,
    %c0_20 = arith.constant 0 : index
    %c1_21 = arith.constant 1 : index
    %c0_22 = arith.constant 0 : index
    %15 = vector.load %arg5[%c0_20, %c1_21, %c0_22] : memref<4x18x18xf32, #tpu.memory_space<vmem>>, vector<4x16x16xf32>
    %16 = vector.shape_cast %15 : vector<4x16x16xf32> to vector<4x256xf32>
    %c12 = arith.constant 12 : index
    %c0_23 = arith.constant 0 : index
    %17 = vector.load %arg6[%c12, %c0_23] : memref<36x256xf32, #tpu.memory_space<vmem>>, vector<4x256xf32>
    tpu.vector_store %arg6[%c12, %c0_23], %16 {strides = array<i32>} : memref<36x256xf32, #tpu.memory_space<vmem>>, vector<4x256xf32>,
    %c0_24 = arith.constant 0 : index
    %c1_25 = arith.constant 1 : index
    %c1_26 = arith.constant 1 : index
    %18 = vector.load %arg5[%c0_24, %c1_25, %c1_26] : memref<4x18x18xf32, #tpu.memory_space<vmem>>, vector<4x16x16xf32>
    %19 = vector.shape_cast %18 : vector<4x16x16xf32> to vector<4x256xf32>
    %c16 = arith.constant 16 : index
    %c0_27 = arith.constant 0 : index
    %20 = vector.load %arg6[%c16, %c0_27] : memref<36x256xf32, #tpu.memory_space<vmem>>, vector<4x256xf32>
    tpu.vector_store %arg6[%c16, %c0_27], %19 {strides = array<i32>} : memref<36x256xf32, #tpu.memory_space<vmem>>, vector<4x256xf32>,
    %c0_28 = arith.constant 0 : index
    %c1_29 = arith.constant 1 : index
    %c2_30 = arith.constant 2 : index
    %21 = vector.load %arg5[%c0_28, %c1_29, %c2_30] : memref<4x18x18xf32, #tpu.memory_space<vmem>>, vector<4x16x16xf32>
    %22 = vector.shape_cast %21 : vector<4x16x16xf32> to vector<4x256xf32>
    %c20 = arith.constant 20 : index
    %c0_31 = arith.constant 0 : index
    %23 = vector.load %arg6[%c20, %c0_31] : memref<36x256xf32, #tpu.memory_space<vmem>>, vector<4x256xf32>
    tpu.vector_store %arg6[%c20, %c0_31], %22 {strides = array<i32>} : memref<36x256xf32, #tpu.memory_space<vmem>>, vector<4x256xf32>,
    %c0_32 = arith.constant 0 : index
    %c2_33 = arith.constant 2 : index
    %c0_34 = arith.constant 0 : index
    %24 = vector.load %arg5[%c0_32, %c2_33, %c0_34] : memref<4x18x18xf32, #tpu.memory_space<vmem>>, vector<4x16x16xf32>
    %25 = vector.shape_cast %24 : vector<4x16x16xf32> to vector<4x256xf32>
    %c24 = arith.constant 24 : index
    %c0_35 = arith.constant 0 : index
    %26 = vector.load %arg6[%c24, %c0_35] : memref<36x256xf32, #tpu.memory_space<vmem>>, vector<4x256xf32>
    tpu.vector_store %arg6[%c24, %c0_35], %25 {strides = array<i32>} : memref<36x256xf32, #tpu.memory_space<vmem>>, vector<4x256xf32>,
    %c0_36 = arith.constant 0 : index
    %c2_37 = arith.constant 2 : index
    %c1_38 = arith.constant 1 : index
    %27 = vector.load %arg5[%c0_36, %c2_37, %c1_38] : memref<4x18x18xf32, #tpu.memory_space<vmem>>, vector<4x16x16xf32>
    %28 = vector.shape_cast %27 : vector<4x16x16xf32> to vector<4x256xf32>
    %c28 = arith.constant 28 : index
    %c0_39 = arith.constant 0 : index
    %29 = vector.load %arg6[%c28, %c0_39] : memref<36x256xf32, #tpu.memory_space<vmem>>, vector<4x256xf32>
    tpu.vector_store %arg6[%c28, %c0_39], %28 {strides = array<i32>} : memref<36x256xf32, #tpu.memory_space<vmem>>, vector<4x256xf32>,
    %c0_40 = arith.constant 0 : index
    %c2_41 = arith.constant 2 : index
    %c2_42 = arith.constant 2 : index
    %30 = vector.load %arg5[%c0_40, %c2_41, %c2_42] : memref<4x18x18xf32, #tpu.memory_space<vmem>>, vector<4x16x16xf32>
    %31 = vector.shape_cast %30 : vector<4x16x16xf32> to vector<4x256xf32>
    %c32 = arith.constant 32 : index
    %c0_43 = arith.constant 0 : index
    %32 = vector.load %arg6[%c32, %c0_43] : memref<36x256xf32, #tpu.memory_space<vmem>>, vector<4x256xf32>
    tpu.vector_store %arg6[%c32, %c0_43], %31 {strides = array<i32>} : memref<36x256xf32, #tpu.memory_space<vmem>>, vector<4x256xf32>,
    %c0_44 = arith.constant 0 : index
    %c0_45 = arith.constant 0 : index
    %33 = vector.load %arg2[%c0_44, %c0_45] : memref<8x36xbf16, #tpu.memory_space<vmem>>, vector<8x36xbf16>
    %c0_46 = arith.constant 0 : index
    %c0_47 = arith.constant 0 : index
    %34 = vector.load %arg6[%c0_46, %c0_47] : memref<36x256xf32, #tpu.memory_space<vmem>>, vector<36x256xf32>
    %35 = arith.truncf %34 : vector<36x256xf32> to vector<36x256xbf16>
    %cst_48 = arith.constant dense<0.000000e+00> : vector<8x256xf32>
    %36 = tpu.matmul %33, %35, %cst_48 {dimension_numbers = #tpu.dot_dimension_numbers<[1], [0], [0], [1], [0, 0, 1, 1], [], []>} : vector<8x36xbf16>, vector<36x256xbf16>, vector<8x256xf32> -> vector<8x256xf32>
    %c0_49 = arith.constant 0 : index
    %c0_50 = arith.constant 0 : index
    %37 = vector.load %arg3[%c0_49, %c0_50] : memref<8x1xf32, #tpu.memory_space<vmem>>, vector<8x1xf32>
    %38 = vector.broadcast %37 : vector<8x1xf32> to vector<8x256xf32>
    %39 = arith.addf %36, %38 : vector<8x256xf32>
    %40 = math.tanh %39 : vector<8x256xf32>
    %cst_51 = arith.constant 5.000000e-01 : f32
    %41 = vector.broadcast %cst_51 : f32 to vector<8x256xf32>
    %42 = arith.mulf %40, %41 : vector<8x256xf32>
    %cst_52 = arith.constant 5.000000e-01 : f32
    %43 = vector.broadcast %cst_52 : f32 to vector<8x256xf32>
    %44 = arith.addf %42, %43 : vector<8x256xf32>
    %45 = vector.shape_cast %44 : vector<8x256xf32> to vector<1x8x256xf32>
    %c0_53 = arith.constant 0 : index
    %c0_54 = arith.constant 0 : index
    %c0_55 = arith.constant 0 : index
    %46 = vector.load %arg4[%c0_53, %c0_54, %c0_55] : memref<1x8x256xf32, #tpu.memory_space<vmem>>, vector<1x8x256xf32>
    tpu.vector_store %arg4[%c0_53, %c0_54, %c0_55], %45 {strides = array<i32>} : memref<1x8x256xf32, #tpu.memory_space<vmem>>, vector<1x8x256xf32>,
    return
  }
  func.func @transform_0(%arg0: i32) -> (i32, i32, i32, i32) {
    %c0_i32 = arith.constant 0 : i32
    %c0_i32_0 = arith.constant 0 : i32
    %c0_i32_1 = arith.constant 0 : i32
    %c0_i32_2 = arith.constant 0 : i32
    return %arg0, %c0_i32, %c0_i32_0, %c0_i32_1 : i32, i32, i32, i32
  }
  func.func @transform_1(%arg0: i32) -> (i32, i32) {
    %c0_i32 = arith.constant 0 : i32
    %c0_i32_0 = arith.constant 0 : i32
    %c0_i32_1 = arith.constant 0 : i32
    return %c0_i32, %c0_i32_0 : i32, i32
  }
  func.func @transform_2(%arg0: i32) -> (i32, i32) {
    %c0_i32 = arith.constant 0 : i32
    %c0_i32_0 = arith.constant 0 : i32
    %c0_i32_1 = arith.constant 0 : i32
    return %c0_i32, %c0_i32_0 : i32, i32
  }
  func.func @transform_3(%arg0: i32) -> (i32, i32, i32) {
    %c0_i32 = arith.constant 0 : i32
    %c0_i32_0 = arith.constant 0 : i32
    %c0_i32_1 = arith.constant 0 : i32
    return %arg0, %c0_i32, %c0_i32_0 : i32, i32, i32
  }
}

</mosaic_0001>

<bundles_post_ra>
// kernel: tpu_custom_call.1
= control target key start
LH: loop header
LB: loop body
LE: loop exit
PB: predicated region body
PF: predicated region fallthrough
CT: control target
= control target key end

     0   :  { %8 = vsyncpa [#allocation5], 0  ;;  %s4550_s0 = inlined_call_operand.hbm [shape: bf16[2,4,16,16], index: 0, kind: input, shape index: {}]   ;;  %s4551_s1 = inlined_call_operand.vmem [shape: bf16[8,36], index: 1, kind: input, shape index: {}]   ;;  %s4552_s2 = inlined_call_operand.vmem [shape: f32[8,1], index: 2, kind: input, shape index: {}]   ;;  %s4553_s3 = inlined_call_operand.hbm [shape: f32[2,8,256], index: 3, kind: output, shape index: {}]  }
   0x1   :  { %10 = vsyncpa [#allocation5 + $0x1], 0 }
   0x2   :  { %11 = vsyncpa [#allocation6], 0 }
   0x3   :  { %13 = vsyncpa [#allocation6 + $0x1], 0  ;;  %s2880_s12 = smov 0   ;;  %s2882_s13 = smov 0  }
   0x4   :  { %s2884_s14 = smov 0   ;;  %s2886_s15 = smov 0  }
   0x5 LB: > { %s2901_s16 = sadd.s32 4294967295, %s2840_s15   ;;  %s2596_s17 = sadd.s32 4294967294, %s2840_s15   ;;  %s2840_s15 = sphi %s2886_s15, %s4732_s15   ;;  %s2836_s14 = sphi %s2884_s14, %s4731_s14   ;;  %s2832_s13 = sphi %s2882_s13, %s4730_s13   ;;  %s2828_s12 = sphi %s2880_s12, %s4729_s12  }
   0x6   : > { %s2905_s18 = sadd.s32 1, %s2840_s15   ;;  %s26_s19 = sadd.s32 1, %s2836_s14 }
   0x7   : > { %s23_s20 = ssub.s32 %s2840_s15, %s2905_s18  ;;  %p33_p0 = scmp.ne.s32.totalorder %s2836_s14, %s2832_s13 }
   0x8   : > { %p24_p1 = scmp.eq.s32.totalorder %s23_s20, 0  ;;  %p34_p2 = scmp.eq.s32.totalorder %s2840_s15, 0 }
   0x9   : > { %p39_p3 = scmp.ne.s32.totalorder %s2832_s13, %s2828_s12  ;;  %p40_p4 = scmp.eq.s32.totalorder %s2901_s16, 0 }
   0xa   : > { %s2917_s21 = scalar_select %p24_p1, %s2836_s14, %s26_s19  }
   0xb   : > { %p2919_p5 = por %p34_p2, %p33_p0  ;;  %p2923_p6 = por %p40_p4, %p39_p3 }
   0xc   : > { %p105_p7 = scmp.eq.s32.totalorder %s2901_s16, 1  ;;  %p111_p8 = scmp.eq.s32.totalorder %s2596_s17, 1 }
   0xd   : > { %s4593_s23 = scalar_select %p2923_p6, 1, 0 }
   0xe   : > { %p2645_p10 = scmp.lt.s32.totalorder %s2840_s15, 2  ;;  %p2930_p11 = por %p105_p7, %p33_p0 }
   0xf   : > { %p2934_p12 = por %p111_p8, %p39_p3  ;;  %s137_s26 = sand.u32 1, %s2836_s14  }
  0x10   : > { %s4594_s24 = scalar_select %p2930_p11, 1, 0 }
  0x11   : > { %s4595_s25 = scalar_select %p2934_p12, 1, 0 }
  0x12   : > { %s2612_s27 = sshll.u32 %s2840_s15, 9  ;;  %s2599_s28 = sshll.u32 %s137_s26, 5 }
  0x13   : > { %s2943_s4 = scalar_lea.hbm %s4550_s0, %s2612_s27  ;;  %s141_s5 = scalar_lea.vmem [#allocation4], %s2599_s28 }
  0x14   : > { %s148_s6 = sshll.u32 %s141_s5, 4  ;;  %p2947_p13 = pnand %p2645_p10, %p2919_p5  ;;  %s2951_s6 = int_to_ptr.vmem [resolvable:$true] %s148_s6 }
  0x15   : > { %s2953_s8 = scalar_lea.sflag [#allocation5], %s137_s26  ;;  %s2748_s9 = scalar_lea.hbm %s2943_s4, 512 }
  0x16   : > { %p2749_p0 = scmp.ne.s32.totalorder %s2943_s4, %s2748_s9  ;;  %p2750_p1 = pneg %p2947_p13 }
  0x17   : > { %s2753_s17 = scalar_lea.hbm %s4550_s0, 1024  ;;  %p2754_p4 = scmp.lt.s32.totalorder %s2943_s4, %s4550_s0 }
  0x18   : > { %p2751_p2 = pnand %p2750_p1, %p2749_p0  ;;  %p2755_p5 = scmp.lt.s32.totalorder %s2753_s17, %s2748_s9 }
  0x1a   : > { %p2752_p3 = pneg %p2751_p2  ;;  %p2756_p7 = por %p2755_p5, %p2754_p4 }
  0x1c   : > { %p2757_p8 = pnand %p2756_p7, %p2752_p3 }
  0x1e   : > { %2760 = shalt.err (!%p2757_p8)
}
  0x1f   : > { %s2761_s22 = scalar_lea.vmem %s2951_s6, 512  ;;  %s2842_s26 = smov [#allocation4]  }
  0x20   : > { %p2762_p10 = scmp.ne.s32.totalorder %s2951_s6, %s2761_s22  ;;  %s2766_s27 = sshll.u32 %s2842_s26, 4  ;;  %s2767_s27 = int_to_ptr.vmem [resolvable:$false] %s2766_s27 }
  0x21   : > { %s2768_s28 = scalar_lea.vmem %s2767_s27, 1024  ;;  %p2769_p2 = scmp.lt.s32.totalorder %s2951_s6, %s2767_s27 }
  0x22   : > { %p2764_p9 = pnand %p2762_p10, %p2750_p1  ;;  %p2770_p12 = scmp.lt.s32.totalorder %s2768_s28, %s2761_s22 }
  0x24   : > { %p2765_p0 = pneg %p2764_p9  ;;  %p2771_p11 = por %p2770_p12, %p2769_p2 }
  0x26   : > { %p2772_p6 = pnand %p2771_p11, %p2765_p0 }
  0x28   : > { %2775 = shalt.err (!%p2772_p6)
}
  0x29   : > { %s2843_s29 = smov 64   ;;  %s2844_s30 = smov 4  }
  0x2a   : > { %2640 = dma.hbm_to_vmem [thread:$0]  (!%p2947_p13), %s2943_s4, 512, %s2951_s6, %s2953_s8, %s2843_s29, %s2843_s29, %s2844_s30  }
  0x2b   : > { %p2602_p9 = scmp.ge.s32.totalorder %s2840_s15, 1  ;;  %p156_p1 = scmp.lt.s32.totalorder %s2840_s15, 3 }
  0x2d   : > { %p157_p3 = pnand %p2602_p9, %p156_p1 }
  0x2f   : > { %160 = sbr.rel (%p157_p3) target bundleno = 924 (0x39c), region = 32 }
  0x34   : > { %s2977_s5 = sand.u32 1, %s2832_s13   ;;  %p4597_p6 = scmp.ne.s32.totalorder %s4593_s23, 0 }
  0x35   : > { %s2603_s9 = sshll.u32 %s2977_s5, 5  ;;  %s163_s10 = scalar_lea.sflag [#allocation5], %s2977_s5 }
  0x36   : > { %s166_s11 = scalar_lea.vmem [#allocation4], %s2603_s9 }
  0x37   : > { %2819 = dma.done.wait (%p4597_p6), %s163_s10, 512  }
  0x38   : > { %2821 = vsyncadd (%p4597_p6), %s163_s10, 4294966784  ;;  %vm190_vm0 = vcmask 146432   ;;  %vm193_vm1 = vcmask 140288   ;;  %v4556_v0 = vmov 0.0   ;;  %v2631_v1 = vld [vmem:[%s166_s11 + $0x10] sm:$0xff]   ;;  %v2615_v2 = vld [vmem:[%s166_s11] sm:$0xff]   ;;  %v274_v25 = vlaneseq }
  0x39   : > { %198 = vst.msk [vmem:[#allocation2 + $0x30] sm:$0xff] %vm190_vm0, %v4556_v0  ;;  %199 = vst.msk [vmem:[#allocation2 + $0x38] sm:$0xff] %vm190_vm0, %v4556_v0  ;;  %v2632_v3 = vld [vmem:[%s166_s11 + $0x18] sm:$0xff]   ;;  %v2624_v4 = vunpack.c.l.bf16 %v2631_v1  ;;  %v2625_v5 = vunpack.c.h.bf16 %v2631_v1  ;;  %v2616_v6 = vunpack.c.l.bf16 %v2615_v2  ;;  %v2617_v7 = vunpack.c.h.bf16 %v2615_v2  ;;  %v2630_v8 = vld [vmem:[%s166_s11 + $0x8] sm:$0xff]   ;;  %s2846_s23 = smov 1   ;;  %s2848_s4 = smov 126  }
  0x3a   : > { %200 = vst.msk [vmem:[#allocation2 + $0x40] sm:$0x3] %vm193_vm1, %v4556_v0  ;;  %194 = vst.msk [vmem:[#allocation2 + $0x10] sm:$0x3] %vm193_vm1, %v4556_v0  ;;  %v2628_v9 = vunpack.c.l.bf16 %v2632_v3  ;;  %v2629_v10 = vunpack.c.h.bf16 %v2632_v3  ;;  %v2620_v11 = vunpack.c.l.bf16 %v2630_v8  ;;  %v2621_v12 = vunpack.c.h.bf16 %v2630_v8  ;;  %s2849_s6 = smov 127   ;;  %s2851_s7 = smov 32  }
  0x3b   : > { %191 = vst.msk [vmem:[#allocation2] sm:$0xff] %vm190_vm0, %v4556_v0  ;;  %192 = vst.msk [vmem:[#allocation2 + $0x8] sm:$0xff] %vm190_vm0, %v4556_v0  ;;  %v2705_v13 = vpack.i.bf16 %v2625_v5, %v2624_v4  ;;  %v2695_v14 = vpack.i.bf16 %v2617_v7, %v2616_v6  ;;  %vm252_vm2 = vcmask 138248   ;;  %v2847_v23 = vmov 1983009808   ;;  %s2852_s8 = smov 64  }
  0x3c   : > { %195 = vst.msk [vmem:[#allocation2 + $0x18] sm:$0xff] %vm190_vm0, %v4556_v0  ;;  %196 = vst.msk [vmem:[#allocation2 + $0x20] sm:$0xff] %vm190_vm0, %v4556_v0  ;;  %v2710_v15 = vpack.i.bf16 %v2629_v10, %v2628_v9  ;;  %v2700_v16 = vpack.i.bf16 %v2621_v12, %v2620_v11  ;;  %v272_v24 = vunpack.c.l.s4 %v2847_v23  ;;  %v3001_v33 = vshrl.u32 %v274_v25, 7  ;;  %s2853_s17 = smov 16   ;;  %s2854_s19 = smov 48  }
  0x3d   : > { %197 = vst.msk [vmem:[#allocation2 + $0x28] sm:$0x3] %vm193_vm1, %v4556_v0  ;;  %203 = vst.msk [vmem:[#allocation2 + $0x58] sm:$0x3] %vm193_vm1, %v4556_v0  ;;  %2706 = vrot.lane.b32.xlu1 %v2705_v13, %s2846_s23  ;;  %2696 = vrot.lane.b32.xlu0 %v2695_v14, %s2846_s23  ;;  %s2855_s20 = smov 80   ;;  %s2856_s22 = smov 96  }
  0x3e   : > { %201 = vst.msk [vmem:[#allocation2 + $0x48] sm:$0xff] %vm190_vm0, %v4556_v0  ;;  %202 = vst.msk [vmem:[#allocation2 + $0x50] sm:$0xff] %vm190_vm0, %v4556_v0  ;;  %v273_v32 = vunpack.c.0.s8 %v272_v24  ;;  %s2857_s26 = smov 112   ;;  %vm461_vm3 = vcmask 130048   ;;  %vm463_vm4 = vcmask 261120   ;;  %vm465_vm5 = vcmask 392192  }
  0x3f   : > { %vm467_vm6 = vcmask 523264   ;;  %vm469_vm7 = vcmask 654336   ;;  %vm471_vm8 = vcmask 785408   ;;  %vm473_vm9 = vcmask 916480   ;;  %s2604_s9 = sshll.u32 %s2977_s5, 4  ;;  %s2613_s10 = sshll.u32 %s2901_s16, 8 }
  0x40   : > { %v3014_v37 = vsub.s32 %v273_v32, %v3001_v33  ;;  %vm2455_vm10 = vcmask 1041408   ;;  %vm2451_vm11 = vcmask 293888   ;;  %s188_s11 = scalar_lea.vmem [#allocation7], %s2604_s9  ;;  %p4726_p12 = scmp.ne.s32.totalorder %s4594_s24, 0 }
  0x41   : > { %2711 = vrot.lane.b32.xlu1 %v2710_v15, %s2846_s23  ;;  %2701 = vrot.lane.b32.xlu0 %v2700_v16, %s2846_s23  ;;  %s2526_s23 = sshll.u32 %s188_s11, 4  ;;  %s2527_s23 = int_to_ptr.vmem [resolvable:$true] %s2526_s23 }
  0xaf   : > { %v2707_v17 = vpop.permute.xlu1 %2706  ;;  %v2697_v18 = vpop.permute.xlu0 %2696 }
  0xb0   : > { %v2709_v19 = vunpack.i.h.bf16 %v2707_v17  ;;  %v2708_v20 = vunpack.i.l.bf16 %v2707_v17  ;;  %v2699_v21 = vunpack.i.h.bf16 %v2697_v18  ;;  %v2698_v22 = vunpack.i.l.bf16 %v2697_v18 }
  0xb2   : > { %257 = vst.msk [vmem:[#allocation2 + $0x31] sm:$0xff] %vm252_vm2, %v2708_v20  ;;  %258 = vst.msk [vmem:[#allocation2 + $0x39] sm:$0xff] %vm252_vm2, %v2709_v19 }
  0xb3   : > { %253 = vst.msk [vmem:[#allocation2 + $0x1] sm:$0xff] %vm252_vm2, %v2698_v22  ;;  %254 = vst.msk [vmem:[#allocation2 + $0x9] sm:$0xff] %vm252_vm2, %v2699_v21  ;;  %v2712_v26 = vpop.permute.xlu1 %2711  ;;  %v2702_v27 = vpop.permute.xlu0 %2701 }
  0xb4   : > { %v2714_v28 = vunpack.i.h.bf16 %v2712_v26  ;;  %v2713_v29 = vunpack.i.l.bf16 %v2712_v26  ;;  %v2704_v30 = vunpack.i.h.bf16 %v2702_v27  ;;  %v2703_v31 = vunpack.i.l.bf16 %v2702_v27 }
  0xb6   : > { %259 = vst.msk [vmem:[#allocation2 + $0x49] sm:$0xff] %vm252_vm2, %v2713_v29  ;;  %260 = vst.msk [vmem:[#allocation2 + $0x51] sm:$0xff] %vm252_vm2, %v2714_v28 }
  0xb7   : > { %255 = vst.msk [vmem:[#allocation2 + $0x19] sm:$0xff] %vm252_vm2, %v2703_v31  ;;  %256 = vst.msk [vmem:[#allocation2 + $0x21] sm:$0xff] %vm252_vm2, %v2704_v30 }
  0xb9   : > { %v3011_v36 = vld [vmem:[#allocation2 + $0x3a] sm:$0xff]  ;;  %v3020_v38 = vld [vmem:[#allocation2 + $0x32] sm:$0xff] }
  0xba   : > { %v3007_v34 = vld [vmem:[#allocation2 + $0xa] sm:$0xff]  ;;  %v3009_v35 = vld [vmem:[#allocation2 + $0x2] sm:$0xff]  ;;  %v3024_v40 = vld [vmem:[#allocation2 + $0x39] sm:$0xff] }
  0xbb   : > { %2198 = vrot.lane.b32.xlu1 %v3007_v34, %s2848_s4  ;;  %2196 = vrot.lane.b32.xlu0 %v3009_v35, %s2848_s4  ;;  %v3022_v39 = vld [vmem:[#allocation2 + $0x9] sm:$0xff]  ;;  %v1786_v41 = vcombine.low %v3007_v34, %v3011_v36  ;;  %v1787_v42 = vcombine.high %v3007_v34, %v3011_v36  ;;  %v3030_v43 = vld [vmem:[#allocation2 + $0x1] sm:$0xff]  ;;  %v3032_v44 = vld [vmem:[#allocation2 + $0x31] sm:$0xff]  ;;  %v1718_v45 = vcombine.low %v3009_v35, %v3020_v38 }
  0xbc   : > { %v1062_v46 = vcombine.low %v3022_v39, %v3024_v40  ;;  %v1719_v47 = vcombine.high %v3009_v35, %v3020_v38  ;;  %v1063_v48 = vcombine.high %v3022_v39, %v3024_v40  ;;  %v995_v49 = vcombine.high %v3030_v43, %v3032_v44  ;;  %v3116_v17 = vld [vmem:[#allocation2] sm:$0xff]  ;;  %v3118_v18 = vld [vmem:[#allocation2 + $0x30] sm:$0xff] }
  0xbd   : > { %v2187_v52 = vld [vmem:[#allocation2 + $0x52] sm:$0xff]  ;;  %v3047_v53 = vrot.slane %v1786_v41, %v3014_v37  ;;  %v3052_v54 = vld [vmem:[#allocation2 + $0x4a] sm:$0xff]  ;;  %v3059_v58 = vrot.slane %v1787_v42, %v3014_v37  ;;  %v3066_v62 = vrot.slane %v1718_v45, %v3014_v37  ;;  %v269_v26 = vcombine.low %v3116_v17, %v3118_v18 }
  0xbe   : > { %v2183_v50 = vld [vmem:[#allocation2 + $0x22] sm:$0xff]  ;;  %v3044_v51 = vld [vmem:[#allocation2 + $0x1a] sm:$0xff]  ;;  %v3056_v56 = vld [vmem:[#allocation2 + $0x51] sm:$0xff]  ;;  %v3078_v4 = vrot.slane %v1062_v46, %v3014_v37  ;;  %v3092_v9 = vrot.slane %v1719_v47, %v3014_v37  ;;  %v3135_v24 = vrot.slane %v1063_v48, %v3014_v37  ;;  %v3161_v41 = vrot.slane %v995_v49, %v3014_v37 }
  0xbf   : > { %2202 = vrot.lane.b32.xlu1 %v2183_v50, %s2848_s4  ;;  %2200 = vrot.lane.b32.xlu0 %v3044_v51, %s2848_s4  ;;  %v3054_v55 = vld [vmem:[#allocation2 + $0x21] sm:$0xff]  ;;  %v1802_v57 = vcombine.low %v2183_v50, %v2187_v52  ;;  %4598 = vst [vmem:[#allocation10_spill] sm:$0xff] %v3059_v58  ;;  %v1803_v59 = vcombine.high %v2183_v50, %v2187_v52  ;;  %v3061_v60 = vld [vmem:[#allocation2 + $0x19] sm:$0xff]  ;;  %v3063_v61 = vld [vmem:[#allocation2 + $0x49] sm:$0xff] }
  0xc0   : > { %v1734_v63 = vcombine.low %v3044_v51, %v3052_v54  ;;  %v1078_v1 = vcombine.low %v3054_v55, %v3056_v56  ;;  %v1735_v2 = vcombine.high %v3044_v51, %v3052_v54  ;;  %v1011_v5 = vcombine.high %v3061_v60, %v3063_v61  ;;  %4600 = vst [vmem:[#allocation12_spill] sm:$0xff] %v3092_v9  ;;  %v3124_v21 = vld [vmem:[#allocation2 + $0x18] sm:$0xff]  ;;  %v3126_v22 = vld [vmem:[#allocation2 + $0x48] sm:$0xff] }
  0xc1   : > { %v3075_v3 = vrot.slane %v1802_v57, %v3014_v37  ;;  %v3083_v6 = vrot.slane %v1803_v59, %v3014_v37  ;;  %v1079_v19 = vcombine.high %v3054_v55, %v3056_v56  ;;  %4602 = vst [vmem:[#allocation14_spill] sm:$0xff] %v3135_v24  ;;  %v285_v28 = vcombine.low %v3124_v21, %v3126_v22 }
  0xc2   : > { %v3086_v7 = vrot.slane %v1734_v63, %v3014_v37  ;;  %v3089_v8 = vrot.slane %v1078_v1, %v3014_v37  ;;  %v3095_v10 = vrot.slane %v1735_v2, %v3014_v37  ;;  %v3151_v29 = vrot.slane %v269_v26, %v3014_v37  ;;  %4606 = vst [vmem:[#allocation18_spill] sm:$0xff] %v3161_v41 }
  0xc3   : > { %4599 = vst [vmem:[#allocation11_spill] sm:$0xff] %v3083_v6  ;;  %2206 = vrot.lane.b32.xlu1 %v3011_v36, %s2848_s4  ;;  %2204 = vrot.lane.b32.xlu0 %v3020_v38, %s2848_s4  ;;  %v1819_v11 = vcombine.high %v3047_v53, %v3075_v3  ;;  %v1834_v12 = vcombine.low %v3059_v58, %v3083_v6 }
  0xc4   : > { %4601 = vst [vmem:[#allocation13_spill] sm:$0xff] %v3095_v10  ;;  %v1751_v13 = vcombine.high %v3066_v62, %v3086_v7  ;;  %v1095_v14 = vcombine.high %v3078_v4, %v3089_v8  ;;  %v1766_v15 = vcombine.low %v3092_v9, %v3095_v10  ;;  %v1750_v16 = vcombine.low %v3066_v62, %v3086_v7 }
  0xc5   : > { %v1818_v20 = vcombine.low %v3047_v53, %v3075_v3  ;;  %v1094_v23 = vcombine.low %v3078_v4, %v3089_v8  ;;  %v3138_v25 = vrot.slane %v1079_v19, %v3014_v37  ;;  %4604 = vst [vmem:[#allocation16_spill] sm:$0xff] %v3151_v29  ;;  %v3154_v30 = vrot.slane %v285_v28, %v3014_v37 }
  0xc6   : > { %v3164_v42 = vrot.slane %v1011_v5, %v3014_v37 }
  0xc7   : > { %2210 = vrot.lane.b32.xlu1 %v2187_v52, %s2848_s4  ;;  %2208 = vrot.lane.b32.xlu0 %v3052_v54, %s2848_s4  ;;  %4603 = vst [vmem:[#allocation15_spill] sm:$0xff] %v3138_v25  ;;  %v1110_v27 = vcombine.low %v3135_v24, %v3138_v25  ;;  %4605 = vst [vmem:[#allocation17_spill] sm:$0xff] %v3154_v30 }
  0xc8   : > { %4607 = vst [vmem:[#allocation19_spill] sm:$0xff] %v3164_v42 }
  0xcb   : > { %1478 = vrot.lane.b32.xlu1 %v3054_v55, %s2848_s4  ;;  %1474 = vrot.lane.b32.xlu0 %v3022_v39, %s2848_s4 }
  0xcf   : > { %1486 = vrot.lane.b32.xlu1 %v3056_v56, %s2848_s4  ;;  %1482 = vrot.lane.b32.xlu0 %v3024_v40, %s2848_s4 }
  0xd3   : > { %1948 = vrot.lane.b32.xlu1 %v2183_v50, %s2849_s6  ;;  %1944 = vrot.lane.b32.xlu0 %v3007_v34, %s2849_s6  ;;  %v3212_v34 = vld [vmem:[#allocation2 + $0x20] sm:$0xff]  ;;  %v1010_v50 = vcombine.low %v3061_v60, %v3063_v61 }
  0xd4   : > { %4608 = vst [vmem:[#allocation20_spill] sm:$0xff] %v3212_v34 }
  0xd7   : > { %1956 = vrot.lane.b32.xlu1 %v2187_v52, %s2849_s6  ;;  %1952 = vrot.lane.b32.xlu0 %v3011_v36, %s2849_s6  ;;  %v3220_v36 = vld [vmem:[#allocation2 + $0x50] sm:$0xff] }
  0xd8   : > { %4610 = vst [vmem:[#allocation22_spill] sm:$0xff] %v3220_v36 }
  0xdb   : > { %1476 = vrot.lane.b32.xlu1 %v3061_v60, %s2848_s4  ;;  %1472 = vrot.lane.b32.xlu0 %v3030_v43, %s2848_s4 }
  0xdf   : > { %1484 = vrot.lane.b32.xlu1 %v3063_v61, %s2848_s4  ;;  %1480 = vrot.lane.b32.xlu0 %v3032_v44, %s2848_s4 }
  0xe3   : > { %1946 = vrot.lane.b32.xlu1 %v3044_v51, %s2849_s6  ;;  %1942 = vrot.lane.b32.xlu0 %v3009_v35, %s2849_s6  ;;  %v3214_v35 = vld [vmem:[#allocation2 + $0x8] sm:$0xff]  ;;  %v994_v51 = vcombine.low %v3030_v43, %v3032_v44 }
  0xe4   : > { %4609 = vst [vmem:[#allocation21_spill] sm:$0xff] %v3214_v35 }
  0xe7   : > { %1954 = vrot.lane.b32.xlu1 %v3052_v54, %s2849_s6  ;;  %1950 = vrot.lane.b32.xlu0 %v3020_v38, %s2849_s6  ;;  %v3222_v38 = vld [vmem:[#allocation2 + $0x38] sm:$0xff]  ;;  %v1018_v54 = vrot.slane %v1010_v50, %v3014_v37 }
  0xe8   : > { %4611 = vst [vmem:[#allocation23_spill] sm:$0xff] %v3222_v38  ;;  %v337_v57 = vcombine.low %v3214_v35, %v3222_v38 }
  0xea   : > { %v345_v63 = vrot.slane %v337_v57, %v3014_v37 }
  0xeb   : > { %1230 = vrot.lane.b32.xlu1 %v3054_v55, %s2849_s6  ;;  %1226 = vrot.lane.b32.xlu0 %v3022_v39, %s2849_s6  ;;  %v2850_v39 = vmov 1934713408   ;;  %v1002_v55 = vrot.slane %v994_v51, %v3014_v37 }
  0xef   : > { %1238 = vrot.lane.b32.xlu1 %v3056_v56, %s2849_s6  ;;  %1234 = vrot.lane.b32.xlu0 %v3024_v40, %s2849_s6  ;;  %v304_v40 = vunpack.c.l.s4 %v2850_v39 }
  0xf1   : > { %v305_v49 = vunpack.c.0.s8 %v304_v40 }
  0xf3   : > { %1228 = vrot.lane.b32.xlu1 %v3061_v60, %s2849_s6  ;;  %1224 = vrot.lane.b32.xlu0 %v3030_v43, %s2849_s6  ;;  %v3253_v52 = vsub.s32 %v305_v49, %v3001_v33  ;;  %v1027_v43 = vcombine.high %v1002_v55, %v1018_v54 }
  0xf5   : > { %v1833_v56 = vrot.slane %v1819_v11, %v3253_v52  ;;  %v1765_v33 = vrot.slane %v1751_v13, %v3253_v52  ;;  %v1109_v59 = vrot.slane %v1095_v14, %v3253_v52  ;;  %v1041_v60 = vrot.slane %v1027_v43, %v3253_v52 }
  0xf6   : > { %v3288_v1 = vrot.slane %v1834_v12, %v3253_v52  ;;  %v3294_v2 = vrot.slane %v1766_v15, %v3253_v52  ;;  %v3300_v5 = vrot.slane %v1750_v16, %v3253_v52  ;;  %v1026_v13 = vcombine.low %v1002_v55, %v1018_v54 }
  0xf7   : > { %1236 = vrot.lane.b32.xlu1 %v3063_v61, %s2849_s6  ;;  %1232 = vrot.lane.b32.xlu0 %v3032_v44, %s2849_s6  ;;  %v353_v44 = vcombine.low %v3212_v34, %v3220_v36  ;;  %v3323_v7 = vrot.slane %v1110_v27, %v3253_v52  ;;  %v3329_v16 = vrot.slane %v1818_v20, %v3253_v52 }
  0xf8   : > { %4612 = vst [vmem:[#allocation24_spill] sm:$0xff] %v3300_v5  ;;  %v1782_v12 = vcombine.high %v3300_v5, %v4556_v0  ;;  %v3312_v15 = vrot.slane %v1026_v13, %v3253_v52  ;;  %v3343_v53 = vrot.slane %v1094_v23, %v3253_v52  ;;  %v301_v20 = vcombine.low %v3151_v29, %v3154_v30 }
  0xf9   : > { %v361_v61 = vrot.slane %v353_v44, %v3014_v37  ;;  %4615 = vst [vmem:[#allocation27_spill] sm:$0xff] %v3323_v7  ;;  %4616 = vst [vmem:[#allocation28_spill] sm:$0xff] %v3329_v16  ;;  %v1851_v40 = vcombine.high %v1833_v56, %v4556_v0  ;;  %v1127_v43 = vcombine.high %v1109_v59, %v4556_v0 }
  0xfa   : > { %4614 = vst [vmem:[#allocation26_spill] sm:$0xff] %v3312_v15  ;;  %v1058_v62 = vcombine.high %v3312_v15, %v4556_v0  ;;  %4617 = vst [vmem:[#allocation29_spill] sm:$0xff] %v3343_v53  ;;  %v1126_v28 = vcombine.high %v3343_v53, %v4556_v0  ;;  %v3359_v8 = vrot.slane %v301_v20, %v3253_v52 }
  0xfb   : > { %506 = vrot.lane.b32.xlu1 %v3212_v34, %s2849_s6  ;;  %502 = vrot.lane.b32.xlu0 %v3214_v35, %s2849_s6  ;;  %v370_v11 = vcombine.high %v345_v63, %v361_v61  ;;  %v1059_v44 = vcombine.high %v1041_v60, %v4556_v0 }
  0xfc   : > { %4619 = vst [vmem:[#allocation31_spill] sm:$0xff] %v3359_v8  ;;  %v333_v49 = vcombine.high %v3359_v8, %v4556_v0 }
  0xfd   : > { %v3309_v14 = vrot.slane %v370_v11, %v3253_v52 }
  0xff   : > { %514 = vrot.lane.b32.xlu1 %v3220_v36, %s2849_s6  ;;  %510 = vrot.lane.b32.xlu0 %v3222_v38, %s2849_s6  ;;  %4613 = vst [vmem:[#allocation25_spill] sm:$0xff] %v3309_v14 }
 0x103   : > { %504 = vrot.lane.b32.xlu1 %v3124_v21, %s2849_s6  ;;  %500 = vrot.lane.b32.xlu0 %v3116_v17, %s2849_s6 }
 0x107   : > { %512 = vrot.lane.b32.xlu1 %v3126_v22, %s2849_s6  ;;  %508 = vrot.lane.b32.xlu0 %v3118_v18, %s2849_s6 }
 0x10b   : > { %760 = vrot.lane.b32.xlu1 %v3212_v34, %s2848_s4  ;;  %756 = vrot.lane.b32.xlu0 %v3214_v35, %s2848_s4 }
 0x10f   : > { %768 = vrot.lane.b32.xlu1 %v3220_v36, %s2848_s4  ;;  %764 = vrot.lane.b32.xlu0 %v3222_v38, %s2848_s4 }
 0x113   : > { %758 = vrot.lane.b32.xlu1 %v3124_v21, %s2848_s4  ;;  %754 = vrot.lane.b32.xlu0 %v3116_v17, %s2848_s4  ;;  %v369_v17 = vcombine.low %v345_v63, %v361_v61 }
 0x115   : > { %v3346_v3 = vrot.slane %v369_v17, %v3253_v52 }
 0x117   : > { %766 = vrot.lane.b32.xlu1 %v3126_v22, %s2848_s4  ;;  %762 = vrot.lane.b32.xlu0 %v3118_v18, %s2848_s4  ;;  %v1783_v18 = vcombine.high %v1765_v33, %v4556_v0  ;;  %v1850_v22 = vcombine.high %v3329_v16, %v4556_v0  ;;  %4618 = vst [vmem:[#allocation30_spill] sm:$0xff] %v3346_v3 }
 0x118   : > { %v401_v4 = vcombine.high %v3346_v3, %v4556_v0 }
 0x11b   : > { %1887 = vrot.lane.b32.xlu1 %v1833_v56, %s2851_s7  ;;  %1859 = vrot.lane.b32.xlu0 %v1765_v33, %s2851_s7 }
 0x11f   : > { %1163 = vrot.lane.b32.xlu1 %v1109_v59, %s2851_s7  ;;  %1135 = vrot.lane.b32.xlu0 %v1041_v60, %s2851_s7 }
 0x123   : > { %1895 = vrot.lane.b32.xlu1 %v3288_v1, %s2852_s8  ;;  %1867 = vrot.lane.b32.xlu0 %v3294_v2, %s2852_s8 }
 0x127   : > { %1855 = vrot.lane.b32.xlu0 %v1782_v12, %s2853_s17  ;;  %438 = vrot.lane.b32.xlu1 %v3309_v14, %s2851_s7 }
 0x12b   : > { %1131 = vrot.lane.b32.xlu0 %v1058_v62, %s2853_s17  ;;  %1171 = vrot.lane.b32.xlu1 %v3323_v7, %s2852_s8 }
 0x12d   : > { %v3335_v19 = vpop.permute.xlu1 %2198  ;;  %v2197_v21 = vpop.permute.xlu0 %2196 }
 0x12f   : > { %1863 = vrot.lane.b32.xlu0 %v1783_v18, %s2854_s19  ;;  %1883 = vrot.lane.b32.xlu1 %v1850_v22, %s2853_s17  ;;  %v1852_v18 = vcombine.high %v3288_v1, %v4556_v0 }
 0x131   : > { %v3352_v26 = vpop.permute.xlu1 %2202  ;;  %v2201_v27 = vpop.permute.xlu0 %2200 }
 0x133   : > { %1159 = vrot.lane.b32.xlu1 %v1126_v28, %s2853_s17  ;;  %434 = vrot.lane.b32.xlu0 %v401_v4, %s2853_s17 }
 0x135   : > { %v3363_v23 = vpop.permute.xlu1 %2206  ;;  %v2205_v39 = vpop.permute.xlu0 %2204 }
 0x136   : > { %v2288_v50 = vcombine.low %v3335_v19, %v3363_v23  ;;  %v2220_v51 = vcombine.low %v2197_v21, %v2205_v39  ;;  %v2221_v54 = vcombine.high %v2197_v21, %v2205_v39 }
 0x137   : > { %1891 = vrot.lane.b32.xlu1 %v1851_v40, %s2854_s19  ;;  %406 = vrot.lane.b32.xlu0 %v333_v49, %s2853_s17 }
 0x138   : > { %v3376_v63 = vrot.slane %v2288_v50, %v3014_v37  ;;  %v3381_v11 = vrot.slane %v2220_v51, %v3014_v37  ;;  %v3393_v12 = vrot.slane %v2221_v54, %v3014_v37 }
 0x139   : > { %v2211_v55 = vpop.permute.xlu1 %2210  ;;  %v2209_v33 = vpop.permute.xlu0 %2208 }
 0x13a   : > { %v2304_v56 = vcombine.low %v3352_v26, %v2211_v55  ;;  %v2236_v57 = vcombine.low %v2201_v27, %v2209_v33  ;;  %v2237_v61 = vcombine.high %v2201_v27, %v2209_v33 }
 0x13b   : > { %1167 = vrot.lane.b32.xlu1 %v1127_v43, %s2854_s19  ;;  %1139 = vrot.lane.b32.xlu0 %v1059_v44, %s2854_s19 }
 0x13c   : > { %v3384_v13 = vrot.slane %v2304_v56, %v3014_v37  ;;  %v3387_v59 = vrot.slane %v2236_v57, %v3014_v37  ;;  %v3390_v60 = vrot.slane %v2237_v61, %v3014_v37  ;;  %v2305_v61 = vcombine.high %v3352_v26, %v2211_v55 }
 0x13d   : > { %v3395_v62 = vpop.permute.xlu1 %1478  ;;  %v3397_v17 = vpop.permute.xlu0 %1474 }
 0x13e   : > { %v2253_v20 = vcombine.high %v3381_v11, %v3387_v59  ;;  %v2321_v27 = vcombine.high %v3376_v63, %v3384_v13  ;;  %v2268_v4 = vcombine.low %v3393_v12, %v3390_v60  ;;  %v3466_v26 = vrot.slane %v2305_v61, %v3014_v37 }
 0x13f   : > { %1899 = vrot.lane.b32.xlu1 %v1852_v18, %s2855_s20  ;;  %v2269_v5 = vcombine.high %v3393_v12, %v3390_v60 }
 0x140   : > { %v3411_v28 = vrot.slane %v2253_v20, %v3253_v52  ;;  %v3414_v1 = vrot.slane %v2321_v27, %v3253_v52  ;;  %v3437_v33 = vrot.slane %v2268_v4, %v3253_v52  ;;  %v2289_v4 = vcombine.high %v3335_v19, %v3363_v23 }
 0x141   : > { %v3418_v39 = vpop.permute.xlu1 %1486  ;;  %v3420_v40 = vpop.permute.xlu0 %1482  ;;  %v3548_v24 = vrot.slane %v2269_v5, %v3253_v52 }
 0x142   : > { %v1580_v49 = vcombine.low %v3395_v62, %v3418_v39  ;;  %v1564_v50 = vcombine.low %v3397_v17, %v3420_v40  ;;  %2361 = vrot.lane.b32.xlu0 %v3411_v28, %s2851_s7  ;;  %v3479_v23 = vrot.slane %v2289_v4, %v3014_v37  ;;  %v1581_v10 = vcombine.high %v3395_v62, %v3418_v39 }
 0x143   : > { %2389 = vrot.lane.b32.xlu1 %v3414_v1, %s2851_s7  ;;  %v1565_v9 = vcombine.high %v3397_v17, %v3420_v40 }
 0x144   : > { %v3431_v51 = vrot.slane %v1580_v49, %v3014_v37  ;;  %v3434_v54 = vrot.slane %v1564_v50, %v3014_v37  ;;  %v3553_v62 = vrot.slane %v1581_v10, %v3014_v37 }
 0x145   : > { %v3439_v43 = vpop.permute.xlu1 %1948  ;;  %v3441_v44 = vpop.permute.xlu0 %1944  ;;  %v3556_v17 = vrot.slane %v1565_v9, %v3014_v37 }
 0x146   : > { %2369 = vrot.lane.b32.xlu0 %v3437_v33, %s2852_s8  ;;  %v1597_v57 = vcombine.high %v3434_v54, %v3431_v51 }
 0x148   : > { %v3451_v18 = vrot.slane %v1597_v57, %v3253_v52 }
 0x149   : > { %v3453_v20 = vpop.permute.xlu1 %1956  ;;  %v3455_v27 = vpop.permute.xlu0 %1952 }
 0x14a   : > { %v2050_v49 = vcombine.low %v3439_v43, %v3453_v20  ;;  %v2034_v50 = vcombine.low %v3441_v44, %v3455_v27  ;;  %1665 = vrot.lane.b32.xlu1 %v3451_v18, %s2851_s7  ;;  %v2035_v5 = vcombine.high %v3441_v44, %v3455_v27 }
 0x14c   : > { %v3469_v55 = vrot.slane %v2050_v49, %v3014_v37  ;;  %v3472_v57 = vrot.slane %v2034_v50, %v3014_v37  ;;  %v2336_v49 = vcombine.low %v3479_v23, %v3466_v26  ;;  %v3584_v44 = vrot.slane %v2035_v5, %v3014_v37 }
 0x14d   : > { %v3474_v48 = vpop.permute.xlu1 %1476  ;;  %v3476_v19 = vpop.permute.xlu0 %1472 }
 0x14e   : > { %v2067_v61 = vcombine.high %v3472_v57, %v3469_v55  ;;  %v3507_v46 = vrot.slane %v2336_v49, %v3253_v52 }
 0x150   : > { %v3486_v45 = vrot.slane %v2067_v61, %v3253_v52 }
 0x151   : > { %v3490_v50 = vpop.permute.xlu1 %1484  ;;  %v3492_v47 = vpop.permute.xlu0 %1480 }
 0x152   : > { %v1512_v4 = vcombine.low %v3474_v48, %v3490_v50  ;;  %v1496_v32 = vcombine.low %v3476_v19, %v3492_v47  ;;  %2135 = vrot.lane.b32.xlu1 %v3486_v45, %s2851_s7 }
 0x154   : > { %v3501_v31 = vrot.slane %v1512_v4, %v3014_v37  ;;  %v3504_v61 = vrot.slane %v1496_v32, %v3014_v37 }
 0x155   : > { %v3509_v21 = vpop.permute.xlu1 %1946  ;;  %v3511_v56 = vpop.permute.xlu0 %1942 }
 0x156   : > { %2397 = vrot.lane.b32.xlu1 %v3507_v46, %s2852_s8  ;;  %v1529_v0 = vcombine.high %v3504_v61, %v3501_v31 }
 0x158   : > { %v3518_v22 = vrot.slane %v1529_v0, %v3253_v52 }
 0x159   : > { %v3520_v4 = vpop.permute.xlu1 %1954  ;;  %v3522_v32 = vpop.permute.xlu0 %1950 }
 0x15a   : > { %v1982_v49 = vcombine.low %v3509_v21, %v3520_v4  ;;  %v1966_v8 = vcombine.low %v3511_v56, %v3522_v32  ;;  %1637 = vrot.lane.b32.xlu1 %v3518_v22, %s2851_s7 }
 0x15c   : > { %v3531_v15 = vrot.slane %v1982_v49, %v3014_v37  ;;  %v3534_v3 = vrot.slane %v1966_v8, %v3014_v37 }
 0x15d   : > { %v1231_v0 = vpop.permute.xlu1 %1230  ;;  %v1227_v53 = vpop.permute.xlu0 %1226 }
 0x15e   : > { %v1999_v16 = vcombine.high %v3534_v3, %v3531_v15 }
 0x160   : > { %v3545_v49 = vrot.slane %v1999_v16, %v3253_v52  ;;  %v2051_v16 = vcombine.high %v3439_v43, %v3453_v20  ;;  %v1612_v20 = vcombine.low %v3556_v17, %v3553_v62 }
 0x161   : > { %v1239_v25 = vpop.permute.xlu1 %1238  ;;  %v1235_v8 = vpop.permute.xlu0 %1234 }
 0x162   : > { %v1332_v42 = vcombine.low %v1231_v0, %v1239_v25  ;;  %v1333_v41 = vcombine.high %v1231_v0, %v1239_v25  ;;  %v1316_v60 = vcombine.low %v1227_v53, %v1235_v8  ;;  %v1317_v12 = vcombine.high %v1227_v53, %v1235_v8  ;;  %2107 = vrot.lane.b32.xlu0 %v3545_v49, %s2851_s7 }
 0x163   : > { %v1513_v0 = vcombine.high %v3474_v48, %v3490_v50  ;;  %v1497_v8 = vcombine.high %v3476_v19, %v3492_v47  ;;  %v3598_v5 = vrot.slane %v1612_v20, %v3253_v52  ;;  %v1983_v20 = vcombine.high %v3509_v21, %v3520_v4 }
 0x164   : > { %v3563_v39 = vrot.slane %v1332_v42, %v3014_v37  ;;  %v3566_v25 = vrot.slane %v1333_v41, %v3014_v37  ;;  %v3569_v53 = vrot.slane %v1316_v60, %v3014_v37  ;;  %v3572_v10 = vrot.slane %v1317_v12, %v3014_v37 }
 0x165   : > { %v1229_v9 = vpop.permute.xlu1 %1228  ;;  %v1225_v40 = vpop.permute.xlu0 %1224  ;;  %v3581_v41 = vrot.slane %v2051_v16, %v3014_v37 }
 0x166   : > { %2377 = vrot.lane.b32.xlu0 %v3548_v24, %s2856_s22  ;;  %v1349_v42 = vcombine.high %v3569_v53, %v3563_v39 }
 0x168   : > { %v3589_v27 = vrot.slane %v1349_v42, %v3253_v52  ;;  %v2082_v42 = vcombine.low %v3584_v44, %v3581_v41 }
 0x169   : > { %v1237_v60 = vpop.permute.xlu1 %1236  ;;  %v1233_v12 = vpop.permute.xlu0 %1232 }
 0x16a   : > { %v1264_v43 = vcombine.low %v1229_v9, %v1237_v60  ;;  %v1265_v16 = vcombine.high %v1229_v9, %v1237_v60  ;;  %v1248_v30 = vcombine.low %v1225_v40, %v1233_v12  ;;  %v1249_v29 = vcombine.high %v1225_v40, %v1233_v12  ;;  %1417 = vrot.lane.b32.xlu1 %v3589_v27, %s2851_s7 }
 0x16b   : > { %v1527_v9 = vrot.slane %v1513_v0, %v3014_v37  ;;  %v1511_v40 = vrot.slane %v1497_v8, %v3014_v37  ;;  %v3629_v0 = vrot.slane %v2082_v42, %v3253_v52 }
 0x16c   : > { %v3603_v48 = vrot.slane %v1264_v43, %v3014_v37  ;;  %v3606_v47 = vrot.slane %v1265_v16, %v3014_v37  ;;  %v3609_v19 = vrot.slane %v1248_v30, %v3014_v37  ;;  %v3612_v50 = vrot.slane %v1249_v29, %v3014_v37 }
 0x16d   : > { %v1967_v43 = vcombine.high %v3511_v56, %v3522_v32  ;;  %v507_v60 = vpop.permute.xlu1 %506  ;;  %v503_v12 = vpop.permute.xlu0 %502  ;;  %v2337_v30 = vcombine.high %v3479_v23, %v3466_v26  ;;  %v1997_v56 = vrot.slane %v1983_v20, %v3014_v37  ;;  %v1544_v16 = vcombine.low %v1511_v40, %v1527_v9 }
 0x16e   : > { %4620 = vst [vmem:[#allocation32_spill] sm:$0xff] %v3606_v47  ;;  %4621 = vst [vmem:[#allocation33_spill] sm:$0xff] %v3612_v50  ;;  %1673 = vrot.lane.b32.xlu1 %v3598_v5, %s2852_s8  ;;  %v1281_v29 = vcombine.high %v3609_v19, %v3603_v48  ;;  %v1545_v14 = vcombine.high %v1511_v40, %v1527_v9 }
 0x16f   : > { %v1981_v4 = vrot.slane %v1967_v43, %v3014_v37  ;;  %v3641_v26 = vrot.slane %v2337_v30, %v3253_v52 }
 0x170   : > { %v3632_v21 = vrot.slane %v1281_v29, %v3253_v52  ;;  %v3660_v29 = vrot.slane %v1544_v16, %v3253_v52  ;;  %v3724_v40 = vrot.slane %v1545_v14, %v3253_v52 }
 0x171   : > { %v515_v32 = vpop.permute.xlu1 %514  ;;  %v511_v8 = vpop.permute.xlu0 %510  ;;  %v2014_v30 = vcombine.low %v1981_v4, %v1997_v56 }
 0x172   : > { %v608_v35 = vcombine.low %v507_v60, %v515_v32  ;;  %v609_v38 = vcombine.high %v507_v60, %v515_v32  ;;  %v592_v6 = vcombine.low %v503_v12, %v511_v8  ;;  %v593_v58 = vcombine.high %v503_v12, %v511_v8  ;;  %2143 = vrot.lane.b32.xlu1 %v3629_v0, %s2852_s8 }
 0x173   : > { %1389 = vrot.lane.b32.xlu0 %v3632_v21, %s2851_s7  ;;  %v3680_v8 = vrot.slane %v2014_v30, %v3253_v52  ;;  %v1613_v30 = vcombine.high %v3556_v17, %v3553_v62  ;;  %v2083_v17 = vcombine.high %v3584_v44, %v3581_v41 }
 0x174   : > { %v3644_v23 = vrot.slane %v608_v35, %v3014_v37  ;;  %v3647_v42 = vrot.slane %v609_v38, %v3014_v37  ;;  %v3650_v20 = vrot.slane %v592_v6, %v3014_v37  ;;  %v3653_v43 = vrot.slane %v593_v58, %v3014_v37 }
 0x175   : > { %v3655_v60 = vpop.permute.xlu1 %504  ;;  %v3657_v12 = vpop.permute.xlu0 %500  ;;  %v1364_v38 = vcombine.low %v3572_v10, %v3566_v25  ;;  %v1296_v35 = vcombine.low %v3612_v50, %v3606_v47  ;;  %v3715_v62 = vrot.slane %v1613_v30, %v3253_v52 }
 0x176   : > { %4622 = vst [vmem:[#allocation34_spill] sm:$0xff] %v3657_v12  ;;  %2405 = vrot.lane.b32.xlu1 %v3641_v26, %s2856_s22  ;;  %v625_v6 = vcombine.high %v3650_v20, %v3644_v23 }
 0x177   : > { %1645 = vrot.lane.b32.xlu0 %v3660_v29, %s2852_s8  ;;  %v3693_v34 = vrot.slane %v1364_v38, %v3253_v52  ;;  %v3702_v50 = vrot.slane %v1296_v35, %v3253_v52 }
 0x178   : > { %v3671_v58 = vrot.slane %v625_v6, %v3253_v52 }
 0x179   : > { %v3675_v16 = vpop.permute.xlu1 %512  ;;  %v3677_v32 = vpop.permute.xlu0 %508 }
 0x17a   : > { %4623 = vst [vmem:[#allocation35_spill] sm:$0xff] %v3677_v32  ;;  %693 = vrot.lane.b32.xlu1 %v3671_v58, %s2851_s7  ;;  %v540_v6 = vcombine.low %v3655_v60, %v3675_v16  ;;  %v524_v7 = vcombine.low %v3657_v12, %v3677_v32  ;;  %v2015_v32 = vcombine.high %v1981_v4, %v1997_v56 }
 0x17b   : > { %2115 = vrot.lane.b32.xlu0 %v3680_v8, %s2852_s8  ;;  %v4628_v4 = vcombine.low %v3381_v11, %v3387_v59  ;;  %v4630_v59 = vmov 0.0  }
 0x17c   : > { %v3709_v38 = vrot.slane %v540_v6, %v3014_v37  ;;  %v3712_v12 = vrot.slane %v524_v7, %v3014_v37  ;;  %v3737_v6 = vrot.slane %v2083_v17, %v3253_v52  ;;  %v3742_v56 = vrot.slane %v2015_v32, %v3253_v52 }
 0x17d   : > { %v3697_v36 = vpop.permute.xlu1 %760  ;;  %v3699_v47 = vpop.permute.xlu0 %756  ;;  %v3748_v30 = vrot.slane %v4628_v4, %v3253_v52  ;;  %v640_v17 = vcombine.low %v3653_v43, %v3647_v42 }
 0x17e   : > { %4624 = vst [vmem:[#allocation36_spill] sm:$0xff] %v3697_v36  ;;  %4625 = vst [vmem:[#allocation37_spill] sm:$0xff] %v3699_v47  ;;  %1425 = vrot.lane.b32.xlu1 %v3693_v34, %s2852_s8  ;;  %v557_v7 = vcombine.high %v3712_v12, %v3709_v38 }
 0x17f   : > { %1397 = vrot.lane.b32.xlu0 %v3702_v50, %s2852_s8  ;;  %4629 = vst [vmem:[#allocation40_spill] sm:$0xff] %v3748_v30  ;;  %v2284_v4 = vcombine.high %v3748_v30, %v4630_v59 }
 0x181   : > { %v3719_v35 = vpop.permute.xlu1 %768  ;;  %v3721_v9 = vpop.permute.xlu0 %764 }
 0x182   : > { %4626 = vst [vmem:[#allocation38_spill] sm:$0xff] %v3719_v35  ;;  %4627 = vst [vmem:[#allocation39_spill] sm:$0xff] %v3721_v9  ;;  %1681 = vrot.lane.b32.xlu1 %v3715_v62, %s2856_s22  ;;  %v862_v41 = vcombine.low %v3697_v36, %v3719_v35  ;;  %v846_v44 = vcombine.low %v3699_v47, %v3721_v9  ;;  %v3763_v9 = vrot.slane %v557_v7, %v3253_v52 }
 0x183   : > { %1653 = vrot.lane.b32.xlu0 %v3724_v40, %s2856_s22  ;;  %v4631_v36 = vcombine.low %v3434_v54, %v3431_v51  ;;  %v4633_v54 = vcombine.low %v3376_v63, %v3384_v13  ;;  %v1348_v13 = vcombine.low %v3569_v53, %v3563_v39 }
 0x184   : > { %v3757_v47 = vrot.slane %v862_v41, %v3014_v37  ;;  %v3760_v32 = vrot.slane %v846_v44, %v3014_v37  ;;  %v3781_v41 = vrot.slane %v640_v17, %v3253_v52  ;;  %v1528_v44 = vcombine.low %v3504_v61, %v3501_v31 }
 0x185   : > { %v3739_v14 = vpop.permute.xlu1 %758  ;;  %v3773_v35 = vrot.slane %v4631_v36, %v3253_v52  ;;  %v3799_v17 = vrot.slane %v4633_v54, %v3253_v52  ;;  %v1998_v31 = vcombine.low %v3534_v3, %v3531_v15  ;;  %v3803_v61 = vpop.permute.xlu0 %754  ;;  %v4635_v15 = vcombine.low %v3472_v57, %v3469_v55 }
 0x186   : > { %2151 = vrot.lane.b32.xlu1 %v3737_v6, %s2856_s22  ;;  %v879_v7 = vcombine.high %v3760_v32, %v3757_v47  ;;  %v3841_v39 = vrot.slane %v1348_v13, %v3253_v52  ;;  %v2353_v54 = vcombine.high %v3414_v1, %v4630_v59  ;;  %v1280_v1 = vcombine.low %v3609_v19, %v3603_v48 }
 0x187   : > { %2123 = vrot.lane.b32.xlu0 %v3742_v56, %s2856_s22  ;;  %v1628_v36 = vcombine.high %v3773_v35, %v4630_v59  ;;  %v2352_v63 = vcombine.high %v3799_v17, %v4630_v59  ;;  %v3821_v3 = vrot.slane %v4635_v15, %v3253_v52  ;;  %v2099_v15 = vcombine.high %v3486_v45, %v4630_v59 }
 0x188   : > { %v3793_v51 = vrot.slane %v879_v7, %v3253_v52  ;;  %v2286_v45 = vcombine.high %v3437_v33, %v4630_v59  ;;  %v1630_v33 = vcombine.high %v3598_v5, %v4630_v59  ;;  %v878_v5 = vcombine.low %v3760_v32, %v3757_v47 }
 0x189   : > { %v3765_v11 = vpop.permute.xlu1 %766  ;;  %v2098_v55 = vcombine.high %v3821_v3, %v4630_v59  ;;  %v556_v47 = vcombine.low %v3712_v12, %v3709_v38 }
 0x18a   : > { %665 = vrot.lane.b32.xlu1 %v3763_v9, %s2851_s7 }
 0x18b   : > { %2357 = vrot.lane.b32.xlu0 %v2284_v4, %s2853_s17  ;;  %v3931_v12 = vrot.slane %v556_v47, %v3253_v52 }
 0x18d   : > { %v3785_v30 = vpop.permute.xlu1 %1887 }
 0x18e   : > { %4632 = vst [vmem:[#allocation41_spill] sm:$0xff] %v3785_v30  ;;  %701 = vrot.lane.b32.xlu1 %v3781_v41, %s2852_s8  ;;  %v2285_v30 = vcombine.high %v3411_v28, %v4630_v59 }
 0x18f   : > { %1661 = vrot.lane.b32.xlu0 %v1628_v36, %s2853_s17  ;;  %v3810_v36 = vrot.slane %v1528_v44, %v3253_v52  ;;  %v3830_v44 = vrot.slane %v1998_v31, %v3253_v52 }
 0x191   : > { %v3805_v4 = vpop.permute.xlu1 %1163  ;;  %v1560_v7 = vcombine.high %v3810_v36, %v4630_v59  ;;  %v2030_v57 = vcombine.high %v3830_v44, %v4630_v59 }
 0x192   : > { %4634 = vst [vmem:[#allocation42_spill] sm:$0xff] %v3805_v4  ;;  %947 = vrot.lane.b32.xlu1 %v3793_v51, %s2851_s7 }
 0x193   : > { %2365 = vrot.lane.b32.xlu0 %v2285_v30, %s2854_s19  ;;  %v3833_v30 = vpop.permute.xlu0 %762 }
 0x195   : > { %v3825_v28 = vpop.permute.xlu1 %1895 }
 0x196   : > { %4636 = vst [vmem:[#allocation43_spill] sm:$0xff] %v3825_v28  ;;  %2385 = vrot.lane.b32.xlu1 %v2352_v63, %s2853_s17  ;;  %v1380_v63 = vcombine.high %v3841_v39, %v4630_v59 }
 0x197   : > { %1633 = vrot.lane.b32.xlu0 %v1560_v7, %s2853_s17  ;;  %v3849_v31 = vpop.permute.xlu0 %1859  ;;  %v1629_v7 = vcombine.high %v3451_v18, %v4630_v59  ;;  %v1381_v18 = vcombine.high %v3589_v27, %v4630_v59  ;;  %v624_v27 = vcombine.low %v3650_v20, %v3644_v23  ;;  %v2355_v23 = vcombine.high %v3641_v26, %v4630_v59 }
 0x198   : > { %4638 = vst [vmem:[#allocation45_spill] sm:$0xff] %v3849_v31 }
 0x199   : > { %v3843_v53 = vpop.permute.xlu1 %438 }
 0x19a   : > { %4637 = vst [vmem:[#allocation44_spill] sm:$0xff] %v3843_v53  ;;  %2131 = vrot.lane.b32.xlu1 %v2098_v55, %s2853_s17 }
 0x19b   : > { %2103 = vrot.lane.b32.xlu0 %v2030_v57, %s2853_s17  ;;  %v3864_v55 = vpop.permute.xlu0 %1135  ;;  %v2354_v57 = vcombine.high %v3507_v46, %v4630_v59 }
 0x19c   : > { %4640 = vst [vmem:[#allocation47_spill] sm:$0xff] %v3864_v55 }
 0x19d   : > { %v3857_v13 = vpop.permute.xlu1 %1171 }
 0x19e   : > { %2393 = vrot.lane.b32.xlu1 %v2353_v54, %s2854_s19  ;;  %4639 = vst [vmem:[#allocation46_spill] sm:$0xff] %v3857_v13  ;;  %v3872_v54 = vrot.slane %v1280_v1, %v3253_v52  ;;  %v2100_v1 = vcombine.high %v3629_v0, %v4630_v59  ;;  %v3914_v0 = vrot.slane %v878_v5, %v3253_v52 }
 0x19f   : > { %1413 = vrot.lane.b32.xlu0 %v1380_v63, %s2853_s17  ;;  %v3880_v48 = vpop.permute.xlu0 %1867 }
 0x1a0   : > { %4642 = vst [vmem:[#allocation49_spill] sm:$0xff] %v3880_v48  ;;  %v1312_v46 = vcombine.high %v3872_v54, %v4630_v59  ;;  %v910_v26 = vcombine.high %v3914_v0, %v4630_v59 }
 0x1a1   : > { %v3874_v63 = vpop.permute.xlu1 %1883 }
 0x1a2   : > { %2139 = vrot.lane.b32.xlu1 %v2099_v15, %s2854_s19  ;;  %4641 = vst [vmem:[#allocation48_spill] sm:$0xff] %v3874_v63  ;;  %v1561_v15 = vcombine.high %v3518_v22, %v4630_v59  ;;  %v3905_v22 = vrot.slane %v624_v27, %v3253_v52  ;;  %v1313_v27 = vcombine.high %v3632_v21, %v4630_v59 }
 0x1a3   : > { %1669 = vrot.lane.b32.xlu0 %v1629_v7, %s2854_s19  ;;  %v3895_v7 = vpop.permute.xlu0 %1855  ;;  %v778_v21 = vcombine.low %v3803_v61, %v3833_v30 }
 0x1a4   : > { %4644 = vst [vmem:[#allocation51_spill] sm:$0xff] %v3895_v7  ;;  %v4684_v7 = vld [vmem:[#allocation14_spill] sm:$0xff] }
 0x1a5   : > { %v3888_v19 = vpop.permute.xlu1 %1159 }
 0x1a6   : > { %2401 = vrot.lane.b32.xlu1 %v2354_v57, %s2855_s20  ;;  %4643 = vst [vmem:[#allocation50_spill] sm:$0xff] %v3888_v19  ;;  %v2031_v57 = vcombine.high %v3545_v49, %v4630_v59  ;;  %v656_v49 = vcombine.high %v3905_v22, %v4630_v59 }
 0x1a7   : > { %2373 = vrot.lane.b32.xlu0 %v2286_v45, %s2855_s20  ;;  %v3918_v20 = vpop.permute.xlu0 %1131 }
 0x1a8   : > { %4646 = vst [vmem:[#allocation53_spill] sm:$0xff] %v3918_v20  ;;  %v4671_v20 = vld [vmem:[#allocation39_spill] sm:$0xff] }
 0x1a9   : > { %v3907_v45 = vpop.permute.xlu1 %1891 }
 0x1aa   : > { %1421 = vrot.lane.b32.xlu1 %v1381_v18, %s2854_s19  ;;  %4645 = vst [vmem:[#allocation52_spill] sm:$0xff] %v3907_v45  ;;  %v2287_v18 = vcombine.high %v3548_v24, %v4630_v59  ;;  %v1631_v24 = vcombine.high %v3715_v62, %v4630_v59  ;;  %v794_v62 = vcombine.low %v3739_v14, %v3765_v11  ;;  %v4688_v45 = vld [vmem:[#allocation13_spill] sm:$0xff] }
 0x1ab   : > { %1385 = vrot.lane.b32.xlu0 %v1312_v46, %s2853_s17  ;;  %v3934_v38 = vpop.permute.xlu0 %1863  ;;  %v1382_v46 = vcombine.high %v3693_v34, %v4630_v59  ;;  %v2101_v34 = vcombine.high %v3737_v6, %v4630_v59  ;;  %v4652_v6 = vcombine.high %v3572_v10, %v3566_v25  ;;  %v657_v25 = vcombine.high %v3671_v58, %v4630_v59 }
 0x1ac   : > { %4648 = vst [vmem:[#allocation55_spill] sm:$0xff] %v3934_v38 }
 0x1ad   : > { %v3924_v32 = vpop.permute.xlu1 %1167 }
 0x1ae   : > { %1677 = vrot.lane.b32.xlu1 %v1630_v33, %s2855_s20  ;;  %4647 = vst [vmem:[#allocation54_spill] sm:$0xff] %v3924_v32  ;;  %v588_v33 = vcombine.high %v3931_v12, %v4630_v59 }
 0x1af   : > { %1641 = vrot.lane.b32.xlu0 %v1561_v15, %s2854_s19 }
 0x1b1   : > { %v3941_v15 = vpop.permute.xlu1 %1899 }
 0x1b2   : > { %2147 = vrot.lane.b32.xlu1 %v2100_v1, %s2855_s20  ;;  %4649 = vst [vmem:[#allocation56_spill] sm:$0xff] %v3941_v15  ;;  %v3949_v1 = vpop.permute.xlu0 %434 }
 0x1b3   : > { %2111 = vrot.lane.b32.xlu0 %v2031_v57, %s2854_s19  ;;  %4650 = vst [vmem:[#allocation57_spill] sm:$0xff] %v3949_v1  ;;  %v1562_v57 = vcombine.high %v3660_v29, %v4630_v59  ;;  %v2032_v29 = vcombine.high %v3680_v8, %v4630_v59  ;;  %v4672_v1 = vld [vmem:[#allocation37_spill] sm:$0xff] }
 0x1b4   : > { %v847_v13 = vcombine.high %v4672_v1, %v4671_v20 }
 0x1b5   : > { %v3955_v5 = vpop.permute.xlu1 %2389 }
 0x1b6   : > { %2409 = vrot.lane.b32.xlu1 %v2355_v23, %s2857_s26  ;;  %v3964_v23 = vpop.permute.xlu0 %406  ;;  %v4099_v1 = vrot.slane %v847_v13, %v3014_v37  ;;  %v4675_v13 = vcombine.high %v3653_v43, %v3647_v42  ;;  %v4681_v42 = vld [vmem:[#allocation33_spill] sm:$0xff]  ;;  %v4682_v43 = vld [vmem:[#allocation32_spill] sm:$0xff] }
 0x1b7   : > { %689 = vrot.lane.b32.xlu0 %v656_v49, %s2853_s17  ;;  %4651 = vst [vmem:[#allocation58_spill] sm:$0xff] %v3964_v23  ;;  %v1379_v49 = vrot.slane %v4652_v6, %v3253_v52  ;;  %v658_v6 = vcombine.high %v3781_v41, %v4630_v59 }
 0x1ba   : > { %943 = vrot.lane.b32.xlu1 %v910_v26, %s2853_s17  ;;  %v3976_v26 = vrot.slane %v794_v62, %v3014_v37  ;;  %v3991_v8 = vpop.permute.xlu0 %1139 }
 0x1bb   : > { %2381 = vrot.lane.b32.xlu0 %v2287_v18, %s2857_s26  ;;  %v3979_v18 = vrot.slane %v778_v21, %v3014_v37  ;;  %4653 = vst [vmem:[#allocation59_spill] sm:$0xff] %v3991_v8  ;;  %v4664_v8 = vld [vmem:[#allocation23_spill] sm:$0xff] }
 0x1bc   : > { %v3967_v47 = vpop.permute.xlu1 %1665 }
 0x1bd   : > { %v810_v10 = vcombine.low %v3979_v18, %v3976_v26 }
 0x1be   : > { %1429 = vrot.lane.b32.xlu1 %v1382_v46, %s2855_s20  ;;  %v1784_v46 = vcombine.high %v3294_v2, %v4630_v59  ;;  %v589_v2 = vcombine.high %v3763_v9, %v4630_v59 }
 0x1bf   : > { %661 = vrot.lane.b32.xlu0 %v588_v33, %s2853_s17 }
 0x1c2   : > { %1685 = vrot.lane.b32.xlu1 %v1631_v24, %s2857_s26  ;;  %v2033_v24 = vcombine.high %v3742_v56, %v4630_v59 }
 0x1c3   : > { %1393 = vrot.lane.b32.xlu0 %v1313_v27, %s2854_s19  ;;  %v3997_v27 = vpop.permute.xlu0 %2361 }
 0x1c4   : > { %v3985_v33 = vpop.permute.xlu1 %2135 }
 0x1c6   : > { %2155 = vrot.lane.b32.xlu1 %v2101_v34, %s2857_s26  ;;  %v4002_v34 = vrot.slane %v810_v10, %v3253_v52  ;;  %v911_v10 = vcombine.high %v3793_v51, %v4630_v59 }
 0x1c7   : > { %1649 = vrot.lane.b32.xlu0 %v1562_v57, %s2855_s20  ;;  %v4655_v57 = vld [vmem:[#allocation25_spill] sm:$0xff]  ;;  %v4013_v21 = vpop.permute.xlu0 %2369 }
 0x1c8   : > { %4654 = vst [vmem:[#allocation60_spill] sm:$0xff] %v4002_v34  ;;  %v4004_v58 = vpop.permute.xlu1 %2397  ;;  %v402_v62 = vcombine.high %v4655_v57, %v4630_v59  ;;  %v842_v56 = vcombine.high %v4002_v34, %v4630_v59  ;;  %v4657_v57 = vld [vmem:[#allocation34_spill] sm:$0xff]  ;;  %v4685_v34 = vld [vmem:[#allocation15_spill] sm:$0xff] }
 0x1c9   : > { %v4686_v15 = vcombine.high %v4684_v7, %v4685_v34 }
 0x1ca   : > { %1433 = vrot.lane.b32.xlu1 %v1379_v49, %s2856_s22 }
 0x1cb   : > { %2119 = vrot.lane.b32.xlu0 %v2032_v29, %s2855_s20  ;;  %v1314_v29 = vcombine.high %v3702_v50, %v4630_v59  ;;  %v1563_v50 = vcombine.high %v3724_v40, %v4630_v59  ;;  %v4661_v40 = vld [vmem:[#allocation10_spill] sm:$0xff]  ;;  %v1125_v28 = vrot.slane %v4686_v15, %v3253_v52 }
 0x1cc   : > { %v4016_v9 = vpop.permute.xlu1 %1637 }
 0x1ce   : > { %1871 = vrot.lane.b32.xlu1 %v1784_v46, %s2855_s20 }
 0x1cf   : > { %697 = vrot.lane.b32.xlu0 %v657_v25, %s2854_s19 }
 0x1d2   : > { %2127 = vrot.lane.b32.xlu1 %v2033_v24, %s2857_s26  ;;  %v541_v24 = vcombine.high %v3655_v60, %v3675_v16 }
 0x1d3   : > { %669 = vrot.lane.b32.xlu0 %v589_v2, %s2854_s19  ;;  %v4656_v2 = vld [vmem:[#allocation35_spill] sm:$0xff] }
 0x1d4   : > { %v4023_v46 = vpop.permute.xlu0 %2107  ;;  %v525_v41 = vcombine.high %v4657_v57, %v4656_v2  ;;  %v4045_v60 = vrot.slane %v541_v24, %v3014_v37  ;;  %v1383_v24 = vcombine.high %v1379_v49, %v4630_v59  ;;  %v4669_v49 = vld [vmem:[#allocation38_spill] sm:$0xff] }
 0x1d6   : > { %442 = vrot.lane.b32.xlu1 %v402_v62, %s2854_s19  ;;  %v4658_v62 = vld [vmem:[#allocation22_spill] sm:$0xff]  ;;  %v4048_v16 = vrot.slane %v525_v41, %v3014_v37 }
 0x1d7   : > { %915 = vrot.lane.b32.xlu0 %v842_v56, %s2853_s17  ;;  %v4659_v56 = vld [vmem:[#allocation20_spill] sm:$0xff]  ;;  %s2776_s17 = scalar_lea.vmem %s2527_s23, 256 }
 0x1d8   : > { %v4050_v2 = vpop.permute.xlu0 %2377  ;;  %v572_v55 = vcombine.low %v4048_v16, %v4045_v60  ;;  %p2777_p11 = scmp.ne.s32.totalorder %s2527_s23, %s2776_s17 }
 0x1da   : > { %705 = vrot.lane.b32.xlu1 %v658_v6, %s2855_s20  ;;  %v354_v6 = vcombine.high %v4659_v56, %v4658_v62  ;;  %v4665_v62 = vld [vmem:[#allocation21_spill] sm:$0xff]  ;;  %p2778_p13 = pnand %p2777_p11, %p4726_p12 }
 0x1db   : > { %1401 = vrot.lane.b32.xlu0 %v1314_v29, %s2855_s20  ;;  %v4660_v29 = vld [vmem:[#allocation27_spill] sm:$0xff]  ;;  %v338_v56 = vcombine.high %v4665_v62, %v4664_v8 }
 0x1dc   : > { %v4026_v25 = vpop.permute.xlu1 %1417  ;;  %v1128_v23 = vcombine.high %v4660_v29, %v4630_v59  ;;  %v4064_v41 = vrot.slane %v354_v6, %v3014_v37  ;;  %v4670_v6 = vld [vmem:[#allocation36_spill] sm:$0xff]  ;;  %p2779_p4 = pneg %p2778_p13 }
 0x1dd   : > { %v863_v62 = vcombine.high %v4670_v6, %v4669_v49 }
 0x1de   : > { %951 = vrot.lane.b32.xlu1 %v911_v10, %s2854_s19  ;;  %v4662_v10 = vld [vmem:[#allocation11_spill] sm:$0xff] }
 0x1df   : > { %1657 = vrot.lane.b32.xlu0 %v1563_v50, %s2857_s26  ;;  %v4663_v57 = vcombine.high %v4661_v40, %v4662_v10  ;;  %v4666_v40 = vld [vmem:[#allocation16_spill] sm:$0xff]  ;;  %v4667_v10 = vld [vmem:[#allocation17_spill] sm:$0xff]  ;;  %v4096_v20 = vrot.slane %v863_v62, %v3014_v37  ;;  %v4677_v62 = vld [vmem:[#allocation18_spill] sm:$0xff] }
 0x1e0   : > { %v4042_v51 = vpop.permute.xlu1 %1673  ;;  %v4668_v8 = vcombine.high %v4666_v40, %v4667_v10  ;;  %v580_v10 = vrot.slane %v572_v55, %v3253_v52 }
 0x1e1   : > { %v1849_v50 = vrot.slane %v4663_v57, %v3253_v52 }
 0x1e2   : > { %1175 = vrot.lane.b32.xlu1 %v1128_v23, %s2855_s20  ;;  %v316_v57 = vrot.slane %v4668_v8, %v3253_v52  ;;  %v4076_v23 = vrot.slane %v338_v56, %v3014_v37  ;;  %v590_v34 = vcombine.high %v580_v10, %v4630_v59 }
 0x1e3   : > { %1903 = vrot.lane.b32.xlu0 %v1849_v50, %s2856_s22  ;;  %v1853_v4 = vcombine.high %v1849_v50, %v4630_v59 }
 0x1e4   : > { %v4060_v29 = vpop.permute.xlu1 %2143  ;;  %v385_v40 = vcombine.low %v4076_v23, %v4064_v41  ;;  %v334_v7 = vcombine.high %v316_v57, %v4630_v59 }
 0x1e5   : > { %v4068_v53 = vpop.permute.xlu0 %1389 }
 0x1e6   : > { %1437 = vrot.lane.b32.xlu1 %v1383_v24, %s2857_s26  ;;  %v811_v24 = vcombine.high %v3979_v18, %v3976_v26  ;;  %v393_v8 = vrot.slane %v385_v40, %v3253_v52  ;;  %v655_v18 = vrot.slane %v4675_v13, %v3253_v52  ;;  %v4678_v40 = vld [vmem:[#allocation19_spill] sm:$0xff]  ;;  %v4683_v13 = vcombine.high %v4681_v42, %v4682_v43 }
 0x1e7   : > { %410 = vrot.lane.b32.xlu0 %v316_v57, %s2851_s7  ;;  %v779_v57 = vcombine.high %v3803_v61, %v3833_v30 }
 0x1e8   : > { %v4083_v32 = vpop.permute.xlu1 %2405  ;;  %v825_v26 = vrot.slane %v811_v24, %v3253_v52  ;;  %v4679_v24 = vcombine.low %v4677_v62, %v4678_v40 }
 0x1e9   : > { %v4090_v56 = vpop.permute.xlu0 %1645  ;;  %v793_v30 = vrot.slane %v779_v57, %v3014_v37 }
 0x1ea   : > { %4673 = vst [vmem:[#allocation25_spill] sm:$0xff] %v4090_v56  ;;  %1907 = vrot.lane.b32.xlu1 %v1853_v4, %s2857_s26  ;;  %v894_v4 = vcombine.low %v4099_v1, %v4096_v20  ;;  %v1050_v19 = vrot.slane %v4679_v24, %v3253_v52 }
 0x1eb   : > { %673 = vrot.lane.b32.xlu0 %v580_v10, %s2852_s8  ;;  %v2745_v10 = vld [vmem:[#allocation2 + $0x48] sm:$0xff] }
 0x1ec   : > { %v4101_v50 = vpop.permute.xlu1 %693  ;;  %v902_v38 = vrot.slane %v894_v4, %v3253_v52  ;;  %v4687_v4 = vld [vmem:[#allocation12_spill] sm:$0xff] }
 0x1ed   : > { %v4104_v49 = vpop.permute.xlu0 %2115  ;;  %v4689_v63 = vcombine.high %v4687_v4, %v4688_v45 }
 0x1ee   : > { %4674 = vst [vmem:[#allocation35_spill] sm:$0xff] %v4104_v49  ;;  %446 = vrot.lane.b32.xlu1 %v393_v8, %s2852_s8 }
 0x1ef   : > { %919 = vrot.lane.b32.xlu0 %v825_v26, %s2851_s7  ;;  %s2524_s7 = scalar_lea.hbm %s4553_s3, %s2613_s10 }
 0x1f0   : > { %v4111_v55 = vpop.permute.xlu1 %1425 }
 0x1f1   : > { %v4117_v6 = vpop.permute.xlu0 %1397 }
 0x1f2   : > { %4676 = vst [vmem:[#allocation34_spill] sm:$0xff] %v4117_v6  ;;  %709 = vrot.lane.b32.xlu1 %v655_v18, %s2856_s22  ;;  %v1311_v6 = vrot.slane %v4683_v13, %v3253_v52 }
 0x1f3   : > { %1143 = vrot.lane.b32.xlu0 %v1050_v19, %s2852_s8 }
 0x1f4   : > { %v4125_v48 = vpop.permute.xlu1 %1681 }
 0x1f5   : > { %v4128_v31 = vpop.permute.xlu0 %1653 }
 0x1f6   : > { %4680 = vst [vmem:[#allocation22_spill] sm:$0xff] %v4128_v31  ;;  %955 = vrot.lane.b32.xlu1 %v902_v38, %s2852_s8  ;;  %v1781_v31 = vrot.slane %v4689_v63, %v3253_v52  ;;  %v403_v63 = vcombine.high %v393_v8, %v4630_v59  ;;  %v843_v8 = vcombine.high %v825_v26, %v4630_v59 }
 0x1f7   : > { %1405 = vrot.lane.b32.xlu0 %v1311_v6, %s2856_s22  ;;  %v1060_v26 = vcombine.high %v1050_v19, %v4630_v59 }
 0x1f8   : > { %v4136_v24 = vpop.permute.xlu1 %2151  ;;  %v1785_v43 = vcombine.high %v1781_v31, %v4630_v59 }
 0x1f9   : > { %v4146_v56 = vpop.permute.xlu0 %2123 }
 0x1fa   : > { %4690 = vst [vmem:[#allocation20_spill] sm:$0xff] %v4146_v56  ;;  %1179 = vrot.lane.b32.xlu1 %v1125_v28, %s2856_s22  ;;  %v2744_v56 = vld [vmem:[#allocation2 + $0x18] sm:$0xff] }
 0x1fb   : > { %1875 = vrot.lane.b32.xlu0 %v1781_v31, %s2856_s22  ;;  %v795_v31 = vcombine.high %v3739_v14, %v3765_v11  ;;  %v2747_v14 = vld [vmem:[#allocation2 + $0x30] sm:$0xff] }
 0x1fc   : > { %v4150_v42 = vpop.permute.xlu1 %665 }
 0x1fd   : > { %v4153_v13 = vpop.permute.xlu0 %2357  ;;  %v809_v61 = vrot.slane %v795_v31, %v3014_v37 }
 0x1fe   : > { %1879 = vrot.lane.b32.xlu1 %v1785_v43, %s2857_s26  ;;  %v659_v43 = vcombine.high %v655_v18, %v4630_v59  ;;  %v912_v18 = vcombine.high %v902_v38, %v4630_v59 }
 0x1ff   : > { %414 = vrot.lane.b32.xlu0 %v334_v7, %s2854_s19  ;;  %v826_v57 = vcombine.low %v793_v30, %v809_v61 }
 0x200   : > { %v4158_v45 = vpop.permute.xlu1 %701 }
 0x201   : > { %4691 = vst [vmem:[#allocation27_spill] sm:$0xff] %v4158_v45  ;;  %v4161_v15 = vpop.permute.xlu0 %1661  ;;  %v286_v45 = vcombine.high %v2744_v56, %v2745_v10 }
 0x202   : > { %450 = vrot.lane.b32.xlu1 %v403_v63, %s2855_s20  ;;  %v2746_v63 = vld [vmem:[#allocation2] sm:$0xff] }
 0x203   : > { %677 = vrot.lane.b32.xlu0 %v590_v34, %s2855_s20  ;;  %v270_v11 = vcombine.high %v2746_v63, %v2747_v14  ;;  %v4183_v56 = vrot.slane %v286_v45, %v3014_v37  ;;  %v1129_v45 = vcombine.high %v1125_v28, %v4630_v59  ;;  %v834_v63 = vrot.slane %v826_v57, %v3253_v52 }
 0x204   : > { %v4170_v4 = vpop.permute.xlu1 %947  ;;  %v573_v28 = vcombine.high %v4048_v16, %v4045_v60  ;;  %v4692_v60 = vcombine.high %v4677_v62, %v4678_v40  ;;  %v827_v62 = vcombine.high %v793_v30, %v809_v61 }
 0x205   : > { %v4173_v7 = vpop.permute.xlu0 %2365  ;;  %v4190_v31 = vrot.slane %v270_v11, %v3014_v37 }
 0x206   : > { %713 = vrot.lane.b32.xlu1 %v659_v43, %s2857_s26  ;;  %v1057_v16 = vrot.slane %v4692_v60, %v3253_v52 }
 0x207   : > { %923 = vrot.lane.b32.xlu0 %v843_v8, %s2854_s19  ;;  %v386_v8 = vcombine.high %v4076_v23, %v4064_v41  ;;  %v317_v37 = vcombine.low %v4190_v31, %v4183_v56  ;;  %s2859_s19 = smov [#allocation7]  }
 0x208   : > { %v2386_v34 = vpop.permute.xlu1 %2385  ;;  %v1061_v57 = vcombine.high %v1057_v16, %v4630_v59  ;;  %s2780_s16 = sshll.u32 %s2859_s19, 4  ;;  %s2781_s16 = int_to_ptr.vmem [resolvable:$false] %s2780_s16 }
 0x209   : > { %v1634_v49 = vpop.permute.xlu0 %1633  ;;  %v400_v10 = vrot.slane %v386_v8, %v3253_v52  ;;  %v325_v23 = vrot.slane %v317_v37, %v3253_v52  ;;  %v2419_v37 = vsel %vm461_vm3, %v3799_v17, %v2386_v34  ;;  %p2783_p5 = scmp.lt.s32.totalorder %s2527_s23, %s2781_s16 }
 0x20a   : > { %v1688_v43 = vsel %vm461_vm3, %v3810_v36, %v1634_v49  ;;  %959 = vrot.lane.b32.xlu1 %v912_v18, %s2855_s20  ;;  %v1315_v49 = vcombine.high %v1311_v6, %v4630_v59  ;;  %v844_v18 = vcombine.high %v834_v63, %v4630_v59  ;;  %v2420_v61 = vsel %vm463_vm4, %v2419_v37, %v3955_v5 }
 0x20b   : > { %1147 = vrot.lane.b32.xlu0 %v1060_v26, %s2855_s20  ;;  %v4194_v38 = vsel %vm463_vm4, %v1688_v43, %v4016_v9  ;;  %v587_v43 = vrot.slane %v573_v28, %v3253_v52  ;;  %v404_v8 = vcombine.high %v400_v10, %v4630_v59 }
 0x20c   : > { %v4196_v19 = vpop.permute.xlu1 %2131 }
 0x20d   : > { %v4201_v36 = vpop.permute.xlu0 %2103 }
 0x20e   : > { %1183 = vrot.lane.b32.xlu1 %v1129_v45, %s2857_s26 }
 0x20f   : > { %1409 = vrot.lane.b32.xlu0 %v1315_v49, %s2857_s26 }
 0x210   : > { %v2394_v9 = vpop.permute.xlu1 %2393 }
 0x211   : > { %v1414_v41 = vpop.permute.xlu0 %1413  ;;  %v2421_v17 = vsel %vm465_vm5, %v2420_v61, %v2394_v9 }
 0x212   : > { %v1447_v6 = vsel %vm461_vm3, %v3841_v39, %v1414_v41  ;;  %454 = vrot.lane.b32.xlu1 %v400_v10, %s2856_s22  ;;  %v895_v39 = vcombine.high %v4099_v1, %v4096_v20  ;;  %v335_v41 = vcombine.high %v325_v23, %v4630_v59  ;;  %v2422_v5 = vsel %vm467_vm6, %v2421_v17, %v4004_v58 }
 0x213   : > { %418 = vrot.lane.b32.xlu0 %v325_v23, %s2852_s8  ;;  %v1448_v14 = vsel %vm463_vm4, %v1447_v6, %v4026_v25  ;;  %v4693_v6 = vld [vmem:[#allocation40_spill] sm:$0xff]  ;;  %v2858_v17 = vmov 0  }
 0x214   : > { %v4219_v11 = vpop.permute.xlu1 %2139  ;;  %v909_v49 = vrot.slane %v895_v39, %v3253_v52  ;;  %2494 = vmatprep.mubr.bf16.mxu0 %v2858_v17  ;;  %2715 = vset.pattern.permute.xlu0 %v2858_v17 }
 0x215   : > { %v1670_v26 = vpop.permute.xlu0 %1669 }
 0x216   : > { %931 = vrot.lane.b32.xlu1 %v844_v18, %s2855_s20  ;;  %v913_v10 = vcombine.high %v909_v49, %v4630_v59 }
 0x217   : > { %681 = vrot.lane.b32.xlu0 %v587_v43, %s2856_s22 }
 0x218   : > { %v2402_v25 = vpop.permute.xlu1 %2401 }
 0x219   : > { %v2374_v45 = vpop.permute.xlu0 %2373  ;;  %v2423_v23 = vsel %vm469_vm7, %v2422_v5, %v2402_v25 }
 0x21a   : > { %1155 = vrot.lane.b32.xlu1 %v1061_v57, %s2857_s26  ;;  %v2424_v58 = vsel %vm471_vm8, %v2423_v23, %v4083_v32 }
 0x21b   : > { %927 = vrot.lane.b32.xlu0 %v834_v63, %s2852_s8  ;;  %v841_v63 = vrot.slane %v827_v62, %v3253_v52  ;;  %s2512_s8 = scalar_lea.sflag [#allocation6], %s2977_s5 }
 0x21c   : > { %v1422_v40 = vpop.permute.xlu1 %1421 }
 0x21d   : > { %v1449_v20 = vsel %vm465_vm5, %v1448_v14, %v1422_v40  ;;  %v1386_v1 = vpop.permute.xlu0 %1385  ;;  %v845_v18 = vcombine.high %v841_v63, %v4630_v59 }
 0x21e   : > { %458 = vrot.lane.b32.xlu1 %v404_v8, %s2857_s26  ;;  %v4242_v28 = vsel %vm467_vm6, %v1449_v20, %v4111_v55  ;;  %v2412_v55 = vsel %vm461_vm3, %v4693_v6, %v4153_v13  ;;  %v591_v13 = vcombine.high %v587_v43, %v4630_v59  ;;  %v1695_v43 = vsel %vm461_vm3, %v3773_v35, %v4161_v15 }
 0x21f   : > { %1151 = vrot.lane.b32.xlu0 %v1057_v16, %s2856_s22  ;;  %v2413_v9 = vsel %vm463_vm4, %v2412_v55, %v3997_v27  ;;  %v318_v27 = vcombine.high %v4190_v31, %v4183_v56  ;;  %v1696_v35 = vsel %vm463_vm4, %v1695_v43, %v3967_v47  ;;  %v2165_v31 = vsel %vm461_vm3, %v3821_v3, %v4196_v19  ;;  %v4695_v43 = vld [vmem:[#allocation27_spill] sm:$0xff] }
 0x220   : > { %v1678_v30 = vpop.permute.xlu1 %1677  ;;  %v2414_v16 = vsel %vm465_vm5, %v2413_v9, %v4173_v7  ;;  %v2158_v6 = vsel %vm461_vm3, %v3830_v44, %v4201_v36 }
 0x221   : > { %v4250_v34 = vpop.permute.xlu0 %1641  ;;  %v2415_v25 = vsel %vm467_vm6, %v2414_v16, %v4013_v21  ;;  %v332_v21 = vrot.slane %v318_v27, %v3253_v52  ;;  %v2166_v52 = vsel %vm463_vm4, %v2165_v31, %v3985_v33  ;;  %v4694_v16 = vld [vmem:[#allocation35_spill] sm:$0xff] }
 0x222   : > { %967 = vrot.lane.b32.xlu1 %v913_v10, %s2857_s26  ;;  %v2416_v62 = vsel %vm469_vm7, %v2415_v25, %v2374_v45  ;;  %v1697_v45 = vsel %vm465_vm5, %v1696_v35, %v1670_v26 }
 0x223   : > { %422 = vrot.lane.b32.xlu0 %v335_v41, %s2855_s20  ;;  %v2417_v40 = vsel %vm471_vm8, %v2416_v62, %v4050_v2  ;;  %v1698_v3 = vsel %vm467_vm6, %v1697_v45, %v4042_v51  ;;  %v2167_v2 = vsel %vm465_vm5, %v2166_v52, %v4219_v11  ;;  %v4697_v45 = vld [vmem:[#allocation25_spill] sm:$0xff]  ;;  %s2782_s20 = scalar_lea.vmem %s2781_s16, 512 }
 0x224   : > { %v2148_v14 = vpop.permute.xlu1 %2147  ;;  %v1699_v19 = vsel %vm469_vm7, %v1698_v3, %v1678_v30  ;;  %v2168_v11 = vsel %vm467_vm6, %v2167_v2, %v4060_v29  ;;  %v4698_v3 = vld [vmem:[#allocation22_spill] sm:$0xff]  ;;  %p2784_p7 = scmp.lt.s32.totalorder %s2782_s20, %s2776_s17 }
 0x225   : > { %v4264_v60 = vpop.permute.xlu0 %2111  ;;  %v1700_v61 = vsel %vm471_vm8, %v1699_v19, %v4125_v48 }
 0x226   : > { %939 = vrot.lane.b32.xlu1 %v845_v18, %s2857_s26  ;;  %p2785_p8 = por %p2784_p7, %p2783_p5 }
 0x227   : > { %685 = vrot.lane.b32.xlu0 %v591_v13, %s2857_s26 }
 0x228   : > { %v2410_v39 = vpop.permute.xlu1 %2409  ;;  %p2786_p10 = pnand %p2785_p8, %p2779_p4 }
 0x229   : > { %v2425_v7 = vsel %vm473_vm9, %v2424_v58, %v2410_v39  ;;  %v690_v57 = vpop.permute.xlu0 %689 }
 0x22a   : > { %2427 = vst [vmem:[#allocation3 + $0x38] sm:$0xf] %v2425_v7  ;;  %v723_v32 = vsel %vm461_vm3, %v3905_v22, %v690_v57  ;;  %v4696_v7 = vld [vmem:[#allocation20_spill] sm:$0xff] }
 0x22b   : > { %963 = vrot.lane.b32.xlu0 %v909_v49, %s2856_s22  ;;  %v4287_v56 = vsel %vm463_vm4, %v723_v32, %v4101_v50 }
 0x22c   : > { %v944_v15 = vpop.permute.xlu1 %943 }
 0x22d   : > { %v977_v22 = vsel %vm461_vm3, %v3914_v0, %v944_v15  ;;  %v2382_v50 = vpop.permute.xlu0 %2381 }
 0x22e   : > { %v2418_v8 = vsel %vm473_vm9, %v2417_v40, %v2382_v50  ;;  %v4303_v47 = vsel %vm463_vm4, %v977_v22, %v4170_v4  ;;  %v1440_v4 = vsel %vm461_vm3, %v3872_v54, %v1386_v1  ;;  %v336_v54 = vcombine.high %v332_v21, %v4630_v59 }
 0x22f   : > { %2426 = vst [vmem:[#allocation3 + $0x40] sm:$0xf] %v2418_v8  ;;  %426 = vrot.lane.b32.xlu0 %v332_v21, %s2856_s22  ;;  %v2169_v1 = vsel %vm469_vm7, %v2168_v11, %v2148_v14  ;;  %v1441_v30 = vsel %vm463_vm4, %v1440_v4, %v4068_v53  ;;  %v2445_v53 = vld [vmem:[%s4552_s2] sm:$0xff] }
 0x230   : > { %v4310_v0 = vpop.permute.xlu1 %1429  ;;  %v2170_v59 = vsel %vm471_vm8, %v2169_v1, %v4136_v24  ;;  %v2159_v24 = vsel %vm463_vm4, %v2158_v6, %v4023_v46 }
 0x231   : > { %v662_v26 = vpop.permute.xlu0 %661  ;;  %v2438_v49 = vld [vmem:[#allocation3 + $0x38] sm:$0xf]  ;;  %v2160_v23 = vsel %vm465_vm5, %v2159_v24, %v4264_v60 }
 0x232   : > { %v716_v37 = vsel %vm461_vm3, %v3931_v12, %v662_v26  ;;  %v2444_v33 = vpack.c.bf16 %v2438_v49, %v2438_v49  ;;  %v2161_v44 = vsel %vm467_vm6, %v2160_v23, %v4694_v16  ;;  %v4707_v16 = vld [vmem:[#allocation24_spill] sm:$0xff] }
 0x233   : > { %935 = vrot.lane.b32.xlu0 %v841_v63, %s2856_s22  ;;  %v717_v51 = vsel %vm463_vm4, %v716_v37, %v4150_v42 }
 0x234   : > { %2605 = vmatprep.subr.msk.bf16.mxu0 %vm2455_vm10, %v2444_v33  ;;  %v1686_v20 = vpop.permute.xlu1 %1685 }
 0x235   : > { %v1701_v12 = vsel %vm473_vm9, %v1700_v61, %v1686_v20  ;;  %v1394_v10 = vpop.permute.xlu0 %1393  ;;  %v4702_v20 = vld [vmem:[#allocation52_spill] sm:$0xff]  ;;  %v1451_v61 = vsel %vm469_vm7, %v4242_v28, %v4310_v0 }
 0x236   : > { %v1705_v42 = vrot.slane %v1701_v12, 4  ;;  %v4333_v63 = vsel %vm465_vm5, %v1441_v30, %v1394_v10  ;;  %v2437_v29 = vld [vmem:[#allocation3 + $0x40] sm:$0xf]  ;;  %v4703_v10 = vld [vmem:[#allocation43_spill] sm:$0xff] }
 0x237   : > { %430 = vrot.lane.b32.xlu0 %v336_v54, %s2857_s26  ;;  %v2443_v48 = vpack.c.bf16 %v2437_v29, %v2437_v29  ;;  %v4704_v29 = vld [vmem:[#allocation56_spill] sm:$0xff] }
 0x238   : > { %1709 = vst [vmem:[#allocation3 + $0x28] sm:$0xf0] %v1705_v42  ;;  %v2156_v41 = vpop.permute.xlu1 %2155 }
 0x239   : > { %v2171_v55 = vsel %vm473_vm9, %v2170_v59, %v2156_v41  ;;  %v1650_v5 = vpop.permute.xlu0 %1649  ;;  %v2457_v14 = vsel %vm2455_vm10, %v2443_v48, 0 }
 0x23a   : > { %v2175_v18 = vrot.slane %v2171_v55, 4  ;;  %2473 = vmatpush1.bf16.msra.mxu0 %v2457_v14 }
 0x23b   : > { %2448 = vperm.xlu0 %2715, %v2445_v53   ;;  %v4705_v53 = vld [vmem:[#allocation60_spill] sm:$0xff] }
 0x23c   : > { %2179 = vst [vmem:[#allocation3 + $0x20] sm:$0xf0] %v2175_v18  ;;  %v1434_v9 = vpop.permute.xlu1 %1433 }
 0x23d   : > { %v2120_v13 = vpop.permute.xlu0 %2119  ;;  %v1452_v54 = vsel %vm471_vm8, %v1451_v61, %v1434_v9 }
 0x23e   : > { %v2162_v58 = vsel %vm469_vm7, %v2161_v44, %v2120_v13  ;;  %v4706_v13 = vld [vmem:[#allocation51_spill] sm:$0xff] }
 0x23f   : > { %v2163_v60 = vsel %vm471_vm8, %v2162_v58, %v4696_v7  ;;  %v1910_v44 = vsel %vm461_vm3, %v4707_v16, %v4706_v13  ;;  %v4719_v16 = vld [vmem:[#allocation53_spill] sm:$0xff] }
 0x240   : > { %v4352_v36 = vpop.permute.xlu1 %1871 }
 0x241   : > { %v698_v39 = vpop.permute.xlu0 %697 }
 0x242   : > { %v725_v27 = vsel %vm465_vm5, %v4287_v56, %v698_v39  ;;  %v1690_v56 = vsel %vm465_vm5, %v4194_v38, %v4250_v34  ;;  %v4699_v38 = vld [vmem:[#allocation48_spill] sm:$0xff] }
 0x243   : > { %v4359_v46 = vsel %vm467_vm6, %v725_v27, %v4695_v43  ;;  %v1691_v22 = vsel %vm467_vm6, %v1690_v56, %v4697_v45  ;;  %v4700_v34 = vld [vmem:[#allocation28_spill] sm:$0xff]  ;;  %v4708_v27 = vld [vmem:[#allocation45_spill] sm:$0xff] }
 0x244   : > { %v2128_v25 = vpop.permute.xlu1 %2127  ;;  %v1692_v50 = vsel %vm469_vm7, %v1691_v22, %v1650_v5  ;;  %v1917_v49 = vsel %vm461_vm3, %v4700_v34, %v4699_v38  ;;  %v1911_v43 = vsel %vm463_vm4, %v1910_v44, %v4708_v27  ;;  %v4720_v44 = vld [vmem:[#allocation26_spill] sm:$0xff] }
 0x245   : > { %v2164_v57 = vsel %vm473_vm9, %v2163_v60, %v2128_v25  ;;  %v670_v62 = vpop.permute.xlu0 %669  ;;  %v1693_v2 = vsel %vm471_vm8, %v1692_v50, %v4698_v3  ;;  %v4709_v25 = vld [vmem:[#allocation55_spill] sm:$0xff] }
 0x246   : > { %v2174_v32 = vrot.slane %v2164_v57, 4  ;;  %v4365_v35 = vsel %vm465_vm5, %v717_v51, %v670_v62  ;;  %v4701_v51 = vld [vmem:[#allocation41_spill] sm:$0xff]  ;;  %v1912_v7 = vsel %vm465_vm5, %v1911_v43, %v4709_v25  ;;  %v4721_v43 = vld [vmem:[#allocation44_spill] sm:$0xff] }
 0x247   : > { %v1918_v11 = vsel %vm463_vm4, %v1917_v49, %v4701_v51  ;;  %v4710_v62 = vld [vmem:[#allocation49_spill] sm:$0xff] }
 0x248   : > { %2178 = vst [vmem:[#allocation3 + $0x8] sm:$0xf0] %v2174_v32  ;;  %v4367_v15 = vpop.permute.xlu1 %442  ;;  %v1913_v32 = vsel %vm467_vm6, %v1912_v7, %v4710_v62  ;;  %v4722_v62 = vld [vmem:[#allocation47_spill] sm:$0xff] }
 0x249   : > { %v916_v21 = vpop.permute.xlu0 %915 }
 0x24a   : > { %v970_v6 = vsel %vm461_vm3, %v4705_v53, %v916_v21  ;;  %v1914_v21 = vsel %vm469_vm7, %v1913_v32, %v4352_v36 }
 0x24c   : > { %v706_v31 = vpop.permute.xlu1 %705 }
 0x24d   : > { %v4374_v40 = vpop.permute.xlu0 %1401  ;;  %v727_v38 = vsel %vm469_vm7, %v4359_v46, %v706_v31  ;;  %v4716_v31 = vld [vmem:[#allocation34_spill] sm:$0xff] }
 0x250   : > { %v952_v8 = vpop.permute.xlu1 %951 }
 0x251   : > { %v4379_v52 = vsel %vm465_vm5, %v4303_v47, %v952_v8  ;;  %v1658_v19 = vpop.permute.xlu0 %1657  ;;  %v1919_v47 = vsel %vm465_vm5, %v1918_v11, %v4702_v20  ;;  %v4714_v20 = vld [vmem:[#allocation54_spill] sm:$0xff] }
 0x252   : > { %v1694_v26 = vsel %vm473_vm9, %v1693_v2, %v1658_v19  ;;  %v1920_v42 = vsel %vm467_vm6, %v1919_v47, %v4703_v10  ;;  %v4711_v2 = vld [vmem:[#allocation50_spill] sm:$0xff]  ;;  %v4712_v19 = vld [vmem:[#allocation29_spill] sm:$0xff] }
 0x253   : > { %v1704_v4 = vrot.slane %v1694_v26, 4  ;;  %v1921_v17 = vsel %vm469_vm7, %v1920_v42, %v4704_v29  ;;  %v1193_v26 = vsel %vm461_vm3, %v4712_v19, %v4711_v2 }
 0x254   : > { %v1176_v37 = vpop.permute.xlu1 %1175 }
 0x255   : > { %1708 = vst [vmem:[#allocation3 + $0x48] sm:$0xf0] %v1704_v4  ;;  %v1904_v33 = vpop.permute.xlu0 %1903 }
 0x256   : > { %v1922_v48 = vsel %vm471_vm8, %v1921_v17, %v1904_v33  ;;  %v4713_v33 = vld [vmem:[#allocation42_spill] sm:$0xff] }
 0x257   : > { %v1194_v51 = vsel %vm463_vm4, %v1193_v26, %v4713_v33 }
 0x258   : > { %v1438_v1 = vpop.permute.xlu1 %1437  ;;  %v1195_v47 = vsel %vm465_vm5, %v1194_v51, %v4714_v20 }
 0x259   : > { %v1453_v12 = vsel %vm473_vm9, %v1452_v54, %v1438_v1  ;;  %v4396_v30 = vpop.permute.xlu0 %410  ;;  %v4715_v1 = vld [vmem:[#allocation46_spill] sm:$0xff] }
 0x25a   : > { %1455 = vst [vmem:[#allocation3 + $0x28] sm:$0xf] %v1453_v12  ;;  %v1196_v46 = vsel %vm467_vm6, %v1195_v47, %v4715_v1  ;;  %v1443_v12 = vsel %vm467_vm6, %v4333_v63, %v4716_v31 }
 0x25b   : > { %v1197_v10 = vsel %vm469_vm7, %v1196_v46, %v1176_v37  ;;  %v1444_v42 = vsel %vm469_vm7, %v1443_v12, %v4374_v40  ;;  %v4717_v37 = vld [vmem:[#allocation57_spill] sm:$0xff] }
 0x25c   : > { %v1908_v59 = vpop.permute.xlu1 %1907 }
 0x25d   : > { %v1923_v41 = vsel %vm473_vm9, %v1922_v48, %v1908_v59  ;;  %v4404_v28 = vpop.permute.xlu0 %673 }
 0x25e   : > { %1925 = vst [vmem:[#allocation3 + $0x20] sm:$0xf] %v1923_v41 }
 0x260   : > { %v4406_v0 = vpop.permute.xlu1 %446 }
 0x261   : > { %v920_v55 = vpop.permute.xlu0 %919  ;;  %v2434_v24 = vld [vmem:[#allocation3 + $0x28] sm:$0xff] }
 0x262   : > { %v4411_v5 = vsel %vm463_vm4, %v970_v6, %v920_v55 }
 0x264   : > { %v710_v14 = vpop.permute.xlu1 %709 }
 0x265   : > { %v4413_v18 = vpop.permute.xlu0 %1143  ;;  %v2436_v9 = vld [vmem:[#allocation3 + $0x20] sm:$0xff]  ;;  %v728_v34 = vsel %vm471_vm8, %v727_v38, %v710_v14 }
 0x266   : > { %v2442_v23 = vpack.c.bf16 %v2436_v9, %v2434_v24  ;;  %v4718_v24 = vld [vmem:[#allocation30_spill] sm:$0xff] }
 0x267   : > { %v475_v40 = vsel %vm461_vm3, %v4718_v24, %v4717_v37 }
 0x268   : > { %v4418_v58 = vpop.permute.xlu1 %955  ;;  %2474 = vmatprep.subr.bf16.mxu0 %v2442_v23  ;;  %v476_v25 = vsel %vm463_vm4, %v475_v40, %v4721_v43 }
 0x269   : > { %v1406_v39 = vpop.permute.xlu0 %1405 }
 0x26a   : > { %v1445_v48 = vsel %vm471_vm8, %v1444_v42, %v1406_v39  ;;  %v1186_v39 = vsel %vm461_vm3, %v4720_v44, %v4719_v16  ;;  %v4724_v42 = vld [vmem:[#allocation58_spill] sm:$0xff] }
 0x26b   : > { %v1187_v32 = vsel %vm463_vm4, %v1186_v39, %v4722_v62 }
 0x26c   : > { %v1180_v60 = vpop.permute.xlu1 %1179 }
 0x26d   : > { %v1876_v57 = vpop.permute.xlu0 %1875  ;;  %v1198_v29 = vsel %vm471_vm8, %v1197_v10, %v1180_v60  ;;  %v477_v60 = vsel %vm465_vm5, %v476_v25, %v4367_v15 }
 0x26e   : > { %v1915_v56 = vsel %vm471_vm8, %v1914_v21, %v1876_v57  ;;  %v478_v21 = vsel %vm467_vm6, %v477_v60, %v4406_v0 }
 0x270   : > { %v1880_v45 = vpop.permute.xlu1 %1879 }
 0x271   : > { %v1916_v22 = vsel %vm473_vm9, %v1915_v56, %v1880_v45  ;;  %v4430_v50 = vpop.permute.xlu0 %414  ;;  %v4723_v56 = vld [vmem:[#allocation59_spill] sm:$0xff] }
 0x272   : > { %1924 = vst [vmem:[#allocation3 + $0x8] sm:$0xf] %v1916_v22  ;;  %v1188_v45 = vsel %vm465_vm5, %v1187_v32, %v4723_v56 }
 0x273   : > { %v1189_v2 = vsel %vm467_vm6, %v1188_v45, %v4413_v18  ;;  %v719_v18 = vsel %vm467_vm6, %v4365_v35, %v4404_v28 }
 0x274   : > { %v451_v8 = vpop.permute.xlu1 %450 }
 0x275   : > { %v678_v3 = vpop.permute.xlu0 %677  ;;  %v479_v22 = vsel %vm469_vm7, %v478_v21, %v451_v8 }
 0x276   : > { %v720_v8 = vsel %vm469_vm7, %v719_v18, %v678_v3 }
 0x278   : > { %v714_v36 = vpop.permute.xlu1 %713 }
 0x279   : > { %v729_v49 = vsel %vm473_vm9, %v728_v34, %v714_v36  ;;  %v4439_v4 = vpop.permute.xlu0 %923  ;;  %v2435_v13 = vld [vmem:[#allocation3 + $0x8] sm:$0xff] }
 0x27a   : > { %v733_v11 = vrot.slane %v729_v49, 4  ;;  %v972_v28 = vsel %vm465_vm5, %v4411_v5, %v4439_v4 }
 0x27c   : > { %737 = vst [vmem:[#allocation3] sm:$0xf0] %v733_v11  ;;  %v960_v61 = vpop.permute.xlu1 %959 }
 0x27d   : > { %v1148_v54 = vpop.permute.xlu0 %1147 }
 0x27e   : > { %v1190_v15 = vsel %vm469_vm7, %v1189_v2, %v1148_v54  ;;  %v980_v54 = vsel %vm467_vm6, %v4379_v52, %v4418_v58 }
 0x27f   : > { %v981_v1 = vsel %vm469_vm7, %v980_v54, %v960_v61 }
 0x280   : > { %v1184_v17 = vpop.permute.xlu1 %1183 }
 0x281   : > { %v1199_v59 = vsel %vm473_vm9, %v1198_v29, %v1184_v17  ;;  %v1410_v41 = vpop.permute.xlu0 %1409  ;;  %v4725_v29 = vld [vmem:[#allocation31_spill] sm:$0xff] }
 0x282   : > { %v1203_v53 = vrot.slane %v1199_v59, 4  ;;  %v1446_v6 = vsel %vm473_vm9, %v1445_v48, %v1410_v41  ;;  %v462_v52 = vsel %vm461_vm3, %v4725_v29, %v4724_v42 }
 0x283   : > { %1454 = vst [vmem:[#allocation3 + $0x48] sm:$0xf] %v1446_v6  ;;  %v464_v58 = vsel %vm463_vm4, %v462_v52, %v4396_v30 }
 0x284   : > { %1207 = vst [vmem:[#allocation3 + $0x10] sm:$0xf0] %v1203_v53  ;;  %v455_v55 = vpop.permute.xlu1 %454  ;;  %v466_v48 = vsel %vm465_vm5, %v464_v58, %v4430_v50 }
 0x285   : > { %v419_v63 = vpop.permute.xlu0 %418  ;;  %v480_v19 = vsel %vm471_vm8, %v479_v22, %v455_v55 }
 0x286   : > { %v468_v5 = vsel %vm467_vm6, %v466_v48, %v419_v63  ;;  %v2428_v63 = vld [vmem:[%s4551_s1] sm:$0xf] }
 0x288   : > { %v932_v14 = vpop.permute.xlu1 %931 }
 0x289   : > { %v682_v9 = vpop.permute.xlu0 %681 }
 0x28a   : > { %v2433_v23 = vld [vmem:[#allocation3 + $0x48] sm:$0xff]  ;;  %v721_v51 = vsel %vm471_vm8, %v720_v8, %v682_v9 }
 0x28b   : > { %v2441_v27 = vpack.c.bf16 %v2435_v13, %v2433_v23 }
 0x28c   : > { %v1156_v7 = vpop.permute.xlu1 %1155 }
 0x28d   : > { %2475 = vmatpush1.bf16.msra.mxu0 %v2441_v27  ;;  %v928_v57 = vpop.permute.xlu0 %927 }
 0x28e   : > { %v973_v10 = vsel %vm467_vm6, %v972_v28, %v928_v57 }
 0x28f   : > { %v974_v61 = vsel %vm469_vm7, %v973_v10, %v932_v14 }
 0x290   : > { %v459_v26 = vpop.permute.xlu1 %458 }
 0x291   : > { %v481_v38 = vsel %vm473_vm9, %v480_v19, %v459_v26  ;;  %v1152_v34 = vpop.permute.xlu0 %1151 }
 0x292   : > { %483 = vst [vmem:[#allocation3] sm:$0xf] %v481_v38  ;;  %v1191_v36 = vsel %vm471_vm8, %v1190_v15, %v1152_v34 }
 0x293   : > { %v1192_v0 = vsel %vm473_vm9, %v1191_v36, %v1156_v7 }
 0x294   : > { %v1202_v49 = vrot.slane %v1192_v0, 4  ;;  %v968_v31 = vpop.permute.xlu1 %967 }
 0x295   : > { %v423_v33 = vpop.permute.xlu0 %422 }
 0x296   : > { %1206 = vst [vmem:[#allocation3 + $0x18] sm:$0xf0] %v1202_v49  ;;  %v470_v55 = vsel %vm469_vm7, %v468_v5, %v423_v33 }
 0x298   : > { %v940_v59 = vpop.permute.xlu1 %939 }
 0x299   : > { %v686_v11 = vpop.permute.xlu0 %685  ;;  %v2430_v53 = vld [vmem:[#allocation3] sm:$0xff] }
 0x29a   : > { %v722_v20 = vsel %vm473_vm9, %v721_v51, %v686_v11 }
 0x29b   : > { %v732_v47 = vrot.slane %v722_v20, 4 }
 0x29d   : > { %736 = vst [vmem:[#allocation3 + $0x30] sm:$0xf0] %v732_v47  ;;  %v964_v46 = vpop.permute.xlu0 %963 }
 0x29e   : > { %v982_v12 = vsel %vm471_vm8, %v981_v1, %v964_v46 }
 0x29f   : > { %v983_v35 = vsel %vm473_vm9, %v982_v12, %v968_v31 }
 0x2a0   : > { %985 = vst [vmem:[#allocation3 + $0x10] sm:$0xf] %v983_v35 }
 0x2a1   : > { %v427_v3 = vpop.permute.xlu0 %426 }
 0x2a2   : > { %v472_v30 = vsel %vm471_vm8, %v470_v55, %v427_v3 }
 0x2a5   : > { %v936_v17 = vpop.permute.xlu0 %935 }
 0x2a6   : > { %v975_v41 = vsel %vm471_vm8, %v974_v61, %v936_v17 }
 0x2a7   : > { %v976_v4 = vsel %vm473_vm9, %v975_v41, %v940_v59  ;;  %v2432_v6 = vld [vmem:[#allocation3 + $0x10] sm:$0xff] }
 0x2a8   : > { %984 = vst [vmem:[#allocation3 + $0x18] sm:$0xf] %v976_v4  ;;  %v2440_v37 = vpack.c.bf16 %v2432_v6, %v2430_v53 }
 0x2a9   : > { %v431_v14 = vpop.permute.xlu0 %430 }
 0x2aa   : > { %v474_v24 = vsel %vm473_vm9, %v472_v30, %v431_v14  ;;  %2476 = vmatprep.subr.bf16.mxu0 %v2440_v37 }
 0x2ab   : > { %482 = vst [vmem:[#allocation3 + $0x30] sm:$0xf] %v474_v24 }
 0x2af   : > { %v2431_v40 = vld [vmem:[#allocation3 + $0x18] sm:$0xff] }
 0x2b2   : > { %v2429_v50 = vld [vmem:[#allocation3 + $0x30] sm:$0xff] }
 0x2b3   : > { %v2439_v9 = vpack.c.bf16 %v2431_v40, %v2429_v50 }
 0x2b5   : > { %2477 = vmatpush1.bf16.msra.mxu0 %v2439_v9 }
 0x2b6   : > { %v2449_v23 = vpop.permute.xlu0 %2448 }
 0x2b8   : > { %2606 = vmatmul.mubr.msk.bf16.vlgmr.msra.gmra.mxu0 %vm2451_vm11, %v2428_v63 }
 0x378   : > { %v2496_v13 = vpop.f32.mrf.mxu0 }
 0x379   : > { %v2497_v16 = vadd.f32 %v2496_v13, %v2449_v23 }
 0x37a   : > { %v2498_v44 = vpop.f32.mrf.mxu0 }
 0x37b   : > { %2740 = vtanh.f32 %v2497_v16  ;;  %v2499_v39 = vadd.f32 %v2498_v44, %v2449_v23 }
 0x37c   : > { %v2500_v27 = vpop.f32.mrf.mxu0 }
 0x37d   : > { %2742 = vtanh.f32 %v2499_v39 }
 0x37e   : > { %v2501_v43 = vpop.f32.mrf.mxu0 }
 0x388   : > { %v2741_v25 = vpop.eup %2740 }
 0x389   : > { %v2505_v7 = vmul.f32 0.5, %v2741_v25 }
 0x38a   : > { %v2743_v60 = vpop.eup %2742 }
 0x38b   : > { %v2507_v57 = vadd.f32 0.5, %v2505_v7  ;;  %v2506_v62 = vmul.f32 0.5, %v2743_v60 }
 0x38d   : > { %v2508_v32 = vadd.f32 0.5, %v2506_v62  ;;  %2509 = vst [vmem:[%s188_s11] sm:$0xff] %v2507_v57 }
 0x38f   : > { %2510 = vst [vmem:[%s188_s11 + $0x8] sm:$0xff] %v2508_v32 }
 0x390   : > { %2789 = shalt.err (!%p2786_p10)
}
 0x391   : > { %s2790_s22 = scalar_lea.hbm %s2524_s7, 256  ;;  %s2794_s27 = scalar_lea.hbm %s4553_s3, 512 }
 0x392   : > { %p2791_p0 = scmp.ne.s32.totalorder %s2524_s7, %s2790_s22  ;;  %p2795_p1 = scmp.lt.s32.totalorder %s2524_s7, %s4553_s3 }
 0x393   : > { %p2796_p3 = scmp.lt.s32.totalorder %s2794_s27, %s2790_s22 }
 0x394   : > { %p2792_p2 = pnand %p2791_p0, %p4726_p12 }
 0x395   : > { %p2797_p6 = por %p2796_p3, %p2795_p1 }
 0x396   : > { %p2793_p9 = pneg %p2792_p2 }
 0x398   : > { %p2798_p11 = pnand %p2797_p6, %p2793_p9 }
 0x39a   : > { %2801 = shalt.err (!%p2798_p11)
}
 0x39b   : > { %2635 = dma.vmem_to_hbm [thread:$0]  (%p4726_p12), %s2527_s23, 256, %s2524_s7, %s2512_s8  }
 0x39c PF: > { %s2538_s30 = sand.u32 1, %s2828_s12   ;;  %p4727_p13 = scmp.ne.s32.totalorder %s4595_s25, 0 }
 0x39d   : > { %p4728_p4 = scmp.ge.s32.totalorder %s2840_s15, 2  ;;  %s2539_s9 = scalar_lea.sflag [#allocation6], %s2538_s30 }
 0x39f   : > { %p2642_p5 = pnand %p4728_p4, %p4727_p13 }
 0x3a1   : > { %p2643_p7 = pneg %p2642_p5 }
 0x3a3   : > { %2823 = dma.done.wait (%p2643_p7), %s2539_s9, 256  }
 0x3a4   : > { %2825 = vsyncadd (%p2643_p7), %s2539_s9, 4294967040  ;;  %p16_p8 = scmp.ge.s32.totalorder %s2905_s18, 4   ;;  %s4729_s12 = smov %s2832_s13 }
 0x3a5   : > { %s4730_s13 = smov %s2836_s14  ;;  %s4731_s14 = smov %s2917_s21 }
 0x3a6   : > { %s4732_s15 = smov %s2905_s18  ;;  %18 = sbr.rel (!%p16_p8) target bundleno = 5 (0x5), region = 77 }
 0x3ab   :  { %2544 = vsyncpa [#allocation5], 1 }
 0x3ac   :  { %2546 = vsyncpa [#allocation5 + $0x1], 1 }
 0x3ad   :  { %2547 = vsyncpa [#allocation6], 1 }
 0x3ae   :  { %2549 = vsyncpa [#allocation6 + $0x1], 1 }

</bundles_post_ra>
